<compile_context>
chip_gen: v7x
topology: tpu7x:2x2x1
jax: 0.10.0
libtpu: 0.0.40
codegen_flags: <defaults>
</compile_context>

<pallas_src>
import math
from functools import partial

import jax
import jax.numpy as jnp
from jax.experimental import pallas as pl
from jax.experimental.pallas import tpu as pltpu

# 64 MiB: above the 16/32 MiB default scoped limits on v5e/v6e, and within
# v7x's 64 MiB physical VMEM.
_VMEM_LIMIT_BYTES = 64 * 1024 * 1024


def _layer_norm_f32(x, gamma, beta, eps):
    # single-pass mean / variance (sum and sum-of-squares): one XLU reduction
    # pair instead of two per LayerNorm.
    mu = jnp.mean(x, axis=-1, keepdims=True)
    ms = jnp.mean(x * x, axis=-1, keepdims=True)
    var = ms - mu * mu
    return (x - mu) * jax.lax.rsqrt(var + eps) * gamma + beta


# ------------------------ Fused BERT encoder layer kernel -------------------
def _bert_layer_kernel(*refs, num_heads, head_dim, q_tile, eps, has_input_ln):
    it = iter(refs)
    x_ref = next(it)                  # (1, S, H) f32, full sequence (K/V rows)
    mask_ref = next(it)               # (1, 1, S) f32
    if has_input_ln:                  # embedding LayerNorm fused into layer 0
        ln0g_ref = next(it); ln0b_ref = next(it)
    wq_ref = next(it); bq_ref = next(it)
    wk_ref = next(it); bk_ref = next(it)
    wv_ref = next(it); bv_ref = next(it)
    wo_ref = next(it); bo_ref = next(it)
    ln1g_ref = next(it); ln1b_ref = next(it)
    w1_ref = next(it); b1_ref = next(it)
    w2_ref = next(it); b2_ref = next(it)
    ln2g_ref = next(it); ln2b_ref = next(it)
    o_ref = next(it)                  # (1, q_tile, H) f32
    ctx_ref = next(it)                # (q_tile, H) bf16 VMEM scratch (head ctx concat)

    x = x_ref[0]                                           # (S, H) f32
    if has_input_ln:
        x = _layer_norm_f32(x, ln0g_ref[...], ln0b_ref[...], eps)
    S, H = x.shape

    # query rows handled by this grid step
    if q_tile == S:
        xq = x
    else:
        q_start = pl.multiple_of(pl.program_id(1) * q_tile, q_tile)
        xq = jax.lax.dynamic_slice_in_dim(x, q_start, q_tile, axis=0)

    # additive key mask, hoisted out of the head loop (kept in f32: -1e9 would
    # overflow bf16's useful range)
    add_mask = (1.0 - mask_ref[0]) * -1e9                  # (1, S)

    xb = x.astype(jnp.bfloat16)
    xqb = xq.astype(jnp.bfloat16)

    # QKV projections: bf16 operands, f32 accumulation on the MXU.
    q = jnp.dot(xqb, wq_ref[...], preferred_element_type=jnp.float32) + bq_ref[...]
    k = jnp.dot(xb, wk_ref[...], preferred_element_type=jnp.float32) + bk_ref[...]
    v = jnp.dot(xb, wv_ref[...], preferred_element_type=jnp.float32) + bv_ref[...]

    scale = 1.0 / math.sqrt(head_dim)
    qb = (q * scale).astype(jnp.bfloat16)                  # (q_tile, H)
    kb = k.astype(jnp.bfloat16)                            # (S, H)
    vb = v.astype(jnp.bfloat16)                            # (S, H)

    # per-head attention; each head's context is written into its lane slice of
    # the (q_tile, H) scratch so the output projection is ONE K=H matmul.
    for h in range(num_heads):                             # static unroll (small nh)
        sl = slice(h * head_dim, (h + 1) * head_dim)
        # q_h @ k_h^T without materializing a transpose (contract last dims)
        scores = jax.lax.dot_general(
            qb[:, sl], kb[:, sl], (((1,), (1,)), ((), ())),
            preferred_element_type=jnp.float32) + add_mask  # (q_tile, S) f32
        m = jnp.max(scores, axis=-1, keepdims=True)
        p = jnp.exp(scores - m)
        # divide -> EUP reciprocal (frees VALU slots during the softmax phase)
        p = p * pl.reciprocal(jnp.sum(p, axis=-1, keepdims=True), approx=True)
        ctx = jnp.dot(p.astype(jnp.bfloat16), vb[:, sl],
                      preferred_element_type=jnp.float32)   # (q_tile, dH)
        ctx_ref[:, sl] = ctx.astype(jnp.bfloat16)

    # single concatenated output projection (replaces nh tiny K=dH matmuls)
    attn_out = jnp.dot(ctx_ref[...], wo_ref[...],
                       preferred_element_type=jnp.float32) + bo_ref[...]

    # residual + LayerNorm 1 (post-LN, as in BERT)
    x1 = _layer_norm_f32(xq + attn_out, ln1g_ref[...], ln1b_ref[...], eps)

    # feed-forward (tanh-approx GELU; BERT's exact erf-GELU differs negligibly)
    f = jnp.dot(x1.astype(jnp.bfloat16), w1_ref[...],
                preferred_element_type=jnp.float32) + b1_ref[...]
    f = jax.nn.gelu(f, approximate=True)
    f = jnp.dot(f.astype(jnp.bfloat16), w2_ref[...],
                preferred_element_type=jnp.float32) + b2_ref[...]

    # residual + LayerNorm 2
    o_ref[0] = _layer_norm_f32(x1 + f, ln2g_ref[...], ln2b_ref[...], eps)


def bert_layer(x, mask3, lp, num_heads, *, input_ln=None, q_tile=None, eps=1e-12):
    B, S, H = x.shape
    I = lp["w1"].shape[1]
    assert H % num_heads == 0
    head_dim = H // num_heads

    if q_tile is None:
        q_tile = S if S <= 128 else 128
    assert S % q_tile == 0, "sequence length must be a multiple of the query tile"
    nq = S // q_tile
    has_input_ln = input_ln is not None

    def rep(shape):                           # weight/bias blocks, same for all steps
        return pl.BlockSpec(shape, lambda b, qt: (0, 0))

    in_specs = [
        pl.BlockSpec((1, S, H), lambda b, qt: (b, 0, 0)),   # x (full row: K/V source)
        pl.BlockSpec((1, 1, S), lambda b, qt: (b, 0, 0)),   # attention mask
    ]
    inputs = [x, mask3]
    if has_input_ln:
        in_specs += [rep((1, H)), rep((1, H))]
        inputs += [input_ln[0], input_ln[1]]
    in_specs += [
        rep((H, H)), rep((1, H)),                           # wq, bq
        rep((H, H)), rep((1, H)),                           # wk, bk
        rep((H, H)), rep((1, H)),                           # wv, bv
        rep((H, H)), rep((1, H)),                           # wo, bo
        rep((1, H)), rep((1, H)),                           # ln1 gamma, beta
        rep((H, I)), rep((1, I)),                           # w1, b1
        rep((I, H)), rep((1, H)),                           # w2, b2
        rep((1, H)), rep((1, H)),                           # ln2 gamma, beta
    ]
    inputs += [lp["wq"], lp["bq"], lp["wk"], lp["bk"], lp["wv"], lp["bv"],
               lp["wo"], lp["bo"], lp["ln1_g"], lp["ln1_b"],
               lp["w1"], lp["b1"], lp["w2"], lp["b2"], lp["ln2_g"], lp["ln2_b"]]

    return pl.pallas_call(
        partial(_bert_layer_kernel, num_heads=num_heads, head_dim=head_dim,
                q_tile=q_tile, eps=eps, has_input_ln=has_input_ln),
        out_shape=jax.ShapeDtypeStruct((B, S, H), jnp.float32),
        grid=(B, nq),
        in_specs=in_specs,
        out_specs=pl.BlockSpec((1, q_tile, H), lambda b, qt: (b, qt, 0)),
        scratch_shapes=[pltpu.VMEM((q_tile, H), jnp.bfloat16)],
        compiler_params=pltpu.CompilerParams(
            dimension_semantics=("parallel", "parallel"),
            vmem_limit_bytes=_VMEM_LIMIT_BYTES),
    )(*inputs)


# ----------------------- Multi-task heads (single matmul) -------------------
def _heads_kernel(x_ref, w_ref, b_ref, o_ref):
    o_ref[...] = (jnp.dot(x_ref[...].astype(jnp.bfloat16), w_ref[...],
                          preferred_element_type=jnp.float32) + b_ref[...])


def heads_matmul(cls_x, w_cat, b_cat):
    """cls_x:(B,H) f32, w_cat:(H,N) bf16, b_cat:(1,N) f32 -> (B,N) f32."""
    B, H = cls_x.shape
    n = w_cat.shape[1]
    # pad output width to a lane-dense multiple of 128 (avoids masked vst.msk
    # partial stores); slice back in the wrapper.
    n_pad = max(128, ((n + 127) // 128) * 128)
    w_p = jnp.zeros((H, n_pad), w_cat.dtype).at[:, :n].set(w_cat)
    b_p = jnp.zeros((1, n_pad), jnp.float32).at[:, :n].set(b_cat)
    out = pl.pallas_call(
        _heads_kernel,
        out_shape=jax.ShapeDtypeStruct((B, n_pad), jnp.float32),
        compiler_params=pltpu.CompilerParams(vmem_limit_bytes=_VMEM_LIMIT_BYTES),
    )(cls_x, w_p, b_p)
    return out[:, :n]


# ------------------------------ Parameter init -------------------------------
def init_params(key, cfg):
    H, I = cfg["hidden"], cfg["intermediate"]
    keys = iter(jax.random.split(key, 128))

    def nrm(shape, scale=0.02, dtype=jnp.bfloat16):
        return (scale * jax.random.normal(next(keys), shape, jnp.float32)).astype(dtype)

    p = {
        "word_emb": nrm((cfg["vocab"], H), dtype=jnp.float32),
        "pos_emb": nrm((cfg["max_pos"], H), dtype=jnp.float32),
        "type_emb": nrm((2, H), dtype=jnp.float32),
        "emb_ln_g": jnp.ones((1, H), jnp.float32),
        "emb_ln_b": jnp.zeros((1, H), jnp.float32),
        "layers": [],
    }
    for _ in range(cfg["num_layers"]):
        p["layers"].append({
            "wq": nrm((H, H)), "bq": jnp.zeros((1, H), jnp.float32),
            "wk": nrm((H, H)), "bk": jnp.zeros((1, H), jnp.float32),
            "wv": nrm((H, H)), "bv": jnp.zeros((1, H), jnp.float32),
            "wo": nrm((H, H)), "bo": jnp.zeros((1, H), jnp.float32),
            "ln1_g": jnp.ones((1, H), jnp.float32),
            "ln1_b": jnp.zeros((1, H), jnp.float32),
            "w1": nrm((H, I)), "b1": jnp.zeros((1, I), jnp.float32),
            "w2": nrm((I, H)), "b2": jnp.zeros((1, H), jnp.float32),
            "ln2_g": jnp.ones((1, H), jnp.float32),
            "ln2_b": jnp.zeros((1, H), jnp.float32),
        })
    p["issue_w"] = nrm((H, cfg["num_issues"]))
    p["issue_b"] = jnp.zeros((1, cfg["num_issues"]), jnp.float32)
    p["framing_w"] = nrm((H, cfg["num_framings"]))
    p["framing_b"] = jnp.zeros((1, cfg["num_framings"]), jnp.float32)
    p["blame_w"] = nrm((H, cfg["num_blames"]))
    p["blame_b"] = jnp.zeros((1, cfg["num_blames"]), jnp.float32)
    p["tone_w"] = nrm((H, 1))
    p["tone_b"] = jnp.zeros((1, 1), jnp.float32)
    return p


# ------------------------------ Forward (module) -----------------------------
def multitask_bert_forward(params, input_ids, attention_mask, cfg):
    B, S = input_ids.shape
    assert len(params["layers"]) >= 1
    # embeddings (gather is glue; everything downstream runs in Pallas kernels)
    emb = (params["word_emb"][input_ids]
           + params["pos_emb"][:S][None, :, :]
           + params["type_emb"][0][None, None, :]).astype(jnp.float32)
    mask3 = attention_mask.astype(jnp.float32).reshape(B, 1, S)

    x = emb
    for li, lp in enumerate(params["layers"]):
        # embedding LayerNorm fused into the first encoder-layer kernel
        input_ln = (params["emb_ln_g"], params["emb_ln_b"]) if li == 0 else None
        x = bert_layer(x, mask3, lp, cfg["num_heads"], input_ln=input_ln)

    cls = x[:, 0, :]                                       # last_hidden_state[:, 0, :]

    w_cat = jnp.concatenate([params["issue_w"], params["framing_w"],
                             params["blame_w"], params["tone_w"]], axis=1)
    b_cat = jnp.concatenate([params["issue_b"], params["framing_b"],
                             params["blame_b"], params["tone_b"]], axis=1)
    logits = heads_matmul(cls, w_cat, b_cat)

    ni, nf, nb = cfg["num_issues"], cfg["num_framings"], cfg["num_blames"]
    return {
        "issue": logits[:, :ni],
        "framing": logits[:, ni:ni + nf],
        "blame": logits[:, ni + nf:ni + nf + nb],
        "tone": logits[:, ni + nf + nb:ni + nf + nb + 1].squeeze(-1),
    }


if __name__ == "__main__":
    # TODO(synk): for long sequences (S >> 128) K/V should be projected once per
    # row and streamed flash-style instead of recomputed per query tile.
    cfg = dict(vocab=100, max_pos=16, hidden=32, intermediate=64,
               num_layers=2, num_heads=2,
               num_issues=5, num_framings=4, num_blames=3)

    key = jax.random.PRNGKey(0)
    pkey, dkey = jax.random.split(key)
    params = init_params(pkey, cfg)

    B, S = 2, 8
    input_ids = jax.random.randint(dkey, (B, S), 0, cfg["vocab"], dtype=jnp.int32)
    attention_mask = jnp.ones((B, S), jnp.int32).at[1, 6:].set(0)   # pad tail of ex. 1

    out = multitask_bert_forward(params, input_ids, attention_mask, cfg)
    jax.block_until_ready(out)

    assert out["issue"].shape == (B, cfg["num_issues"])
    assert out["framing"].shape == (B, cfg["num_framings"])
    assert out["blame"].shape == (B, cfg["num_blames"])
    assert out["tone"].shape == (B,)
    assert all(bool(jnp.all(jnp.isfinite(v))) for v in out.values())
    print("KERNEL_OK")
</pallas_src>

<mosaic_0001>
module attributes {stable_mosaic.version = 11 : i64} {
  func.func @_bert_layer_kernel(%arg0: i32, %arg1: i32, %arg2: memref<1x8x32xf32, #tpu.memory_space<vmem>>, %arg3: memref<1x1x8xf32, #tpu.memory_space<vmem>>, %arg4: memref<1x32xf32, #tpu.memory_space<vmem>>, %arg5: memref<1x32xf32, #tpu.memory_space<vmem>>, %arg6: memref<32x32xbf16, #tpu.memory_space<vmem>>, %arg7: memref<1x32xf32, #tpu.memory_space<vmem>>, %arg8: memref<32x32xbf16, #tpu.memory_space<vmem>>, %arg9: memref<1x32xf32, #tpu.memory_space<vmem>>, %arg10: memref<32x32xbf16, #tpu.memory_space<vmem>>, %arg11: memref<1x32xf32, #tpu.memory_space<vmem>>, %arg12: memref<32x32xbf16, #tpu.memory_space<vmem>>, %arg13: memref<1x32xf32, #tpu.memory_space<vmem>>, %arg14: memref<1x32xf32, #tpu.memory_space<vmem>>, %arg15: memref<1x32xf32, #tpu.memory_space<vmem>>, %arg16: memref<32x64xbf16, #tpu.memory_space<vmem>>, %arg17: memref<1x64xf32, #tpu.memory_space<vmem>>, %arg18: memref<64x32xbf16, #tpu.memory_space<vmem>>, %arg19: memref<1x32xf32, #tpu.memory_space<vmem>>, %arg20: memref<1x32xf32, #tpu.memory_space<vmem>>, %arg21: memref<1x32xf32, #tpu.memory_space<vmem>>, %arg22: memref<1x8x32xf32, #tpu.memory_space<vmem>>, %arg23: memref<8x32xbf16, #tpu.memory_space<vmem>>) attributes {dimension_semantics = [#tpu.dimension_semantics<parallel>, #tpu.dimension_semantics<parallel>], iteration_bounds = array<i64: 2, 1>, scalar_prefetch = 0 : i64, scratch_operands = 1 : i64, tpu.core_type = #tpu.core_type<tc>, window_params = [{transform_indices = @transform_0, window_bounds = array<i64: 1, 8, 32>}, {transform_indices = @transform_1, window_bounds = array<i64: 1, 1, 8>}, {pipeline_mode = #tpu.pipeline_mode<synchronous>, transform_indices = @transform_2, window_bounds = array<i64: 1, 32>}, {pipeline_mode = #tpu.pipeline_mode<synchronous>, transform_indices = @transform_3, window_bounds = array<i64: 1, 32>}, {pipeline_mode = #tpu.pipeline_mode<synchronous>, transform_indices = @transform_4, window_bounds = array<i64: 32, 32>}, {pipeline_mode = #tpu.pipeline_mode<synchronous>, transform_indices = @transform_5, window_bounds = array<i64: 1, 32>}, {pipeline_mode = #tpu.pipeline_mode<synchronous>, transform_indices = @transform_6, window_bounds = array<i64: 32, 32>}, {pipeline_mode = #tpu.pipeline_mode<synchronous>, transform_indices = @transform_7, window_bounds = array<i64: 1, 32>}, {pipeline_mode = #tpu.pipeline_mode<synchronous>, transform_indices = @transform_8, window_bounds = array<i64: 32, 32>}, {pipeline_mode = #tpu.pipeline_mode<synchronous>, transform_indices = @transform_9, window_bounds = array<i64: 1, 32>}, {pipeline_mode = #tpu.pipeline_mode<synchronous>, transform_indices = @transform_10, window_bounds = array<i64: 32, 32>}, {pipeline_mode = #tpu.pipeline_mode<synchronous>, transform_indices = @transform_11, window_bounds = array<i64: 1, 32>}, {pipeline_mode = #tpu.pipeline_mode<synchronous>, transform_indices = @transform_12, window_bounds = array<i64: 1, 32>}, {pipeline_mode = #tpu.pipeline_mode<synchronous>, transform_indices = @transform_13, window_bounds = array<i64: 1, 32>}, {pipeline_mode = #tpu.pipeline_mode<synchronous>, transform_indices = @transform_14, window_bounds = array<i64: 32, 64>}, {pipeline_mode = #tpu.pipeline_mode<synchronous>, transform_indices = @transform_15, window_bounds = array<i64: 1, 64>}, {pipeline_mode = #tpu.pipeline_mode<synchronous>, transform_indices = @transform_16, window_bounds = array<i64: 64, 32>}, {pipeline_mode = #tpu.pipeline_mode<synchronous>, transform_indices = @transform_17, window_bounds = array<i64: 1, 32>}, {pipeline_mode = #tpu.pipeline_mode<synchronous>, transform_indices = @transform_18, window_bounds = array<i64: 1, 32>}, {pipeline_mode = #tpu.pipeline_mode<synchronous>, transform_indices = @transform_19, window_bounds = array<i64: 1, 32>}, {transform_indices = @transform_20, window_bounds = array<i64: 1, 8, 32>}]} {
    %c0 = arith.constant 0 : index
    %c0_0 = arith.constant 0 : index
    %c0_1 = arith.constant 0 : index
    %0 = vector.load %arg2[%c0, %c0_0, %c0_1] : memref<1x8x32xf32, #tpu.memory_space<vmem>>, vector<1x8x32xf32>
    %1 = vector.shape_cast %0 : vector<1x8x32xf32> to vector<8x32xf32>
    %c0_2 = arith.constant 0 : index
    %c0_3 = arith.constant 0 : index
    %2 = vector.load %arg4[%c0_2, %c0_3] : memref<1x32xf32, #tpu.memory_space<vmem>>, vector<1x32xf32>
    %c0_4 = arith.constant 0 : index
    %c0_5 = arith.constant 0 : index
    %3 = vector.load %arg5[%c0_4, %c0_5] : memref<1x32xf32, #tpu.memory_space<vmem>>, vector<1x32xf32>
    %cst = arith.constant dense<0.000000e+00> : vector<8xf32>
    %4 = vector.multi_reduction <add>, %1, %cst [1] : vector<8x32xf32> to vector<8xf32>
    %5 = vector.shape_cast %4 : vector<8xf32> to vector<8x1xf32>
    %cst_6 = arith.constant 3.200000e+01 : f32
    %6 = vector.broadcast %cst_6 : f32 to vector<8x1xf32>
    %7 = arith.divf %5, %6 : vector<8x1xf32>
    %8 = arith.mulf %1, %1 : vector<8x32xf32>
    %cst_7 = arith.constant dense<0.000000e+00> : vector<8xf32>
    %9 = vector.multi_reduction <add>, %8, %cst_7 [1] : vector<8x32xf32> to vector<8xf32>
    %10 = vector.shape_cast %9 : vector<8xf32> to vector<8x1xf32>
    %cst_8 = arith.constant 3.200000e+01 : f32
    %11 = vector.broadcast %cst_8 : f32 to vector<8x1xf32>
    %12 = arith.divf %10, %11 : vector<8x1xf32>
    %13 = arith.mulf %7, %7 : vector<8x1xf32>
    %14 = arith.subf %12, %13 : vector<8x1xf32>
    %15 = vector.broadcast %7 : vector<8x1xf32> to vector<8x32xf32>
    %16 = arith.subf %1, %15 : vector<8x32xf32>
    %cst_9 = arith.constant 9.99999996E-13 : f32
    %17 = vector.broadcast %cst_9 : f32 to vector<8x1xf32>
    %18 = arith.addf %14, %17 : vector<8x1xf32>
    %19 = math.rsqrt %18 : vector<8x1xf32>
    %20 = vector.broadcast %19 : vector<8x1xf32> to vector<8x32xf32>
    %21 = arith.mulf %16, %20 : vector<8x32xf32>
    %22 = vector.broadcast %2 : vector<1x32xf32> to vector<8x32xf32>
    %23 = arith.mulf %21, %22 : vector<8x32xf32>
    %24 = vector.broadcast %3 : vector<1x32xf32> to vector<8x32xf32>
    %25 = arith.addf %23, %24 : vector<8x32xf32>
    %c0_10 = arith.constant 0 : index
    %c0_11 = arith.constant 0 : index
    %c0_12 = arith.constant 0 : index
    %26 = vector.load %arg3[%c0_10, %c0_11, %c0_12] : memref<1x1x8xf32, #tpu.memory_space<vmem>>, vector<1x1x8xf32>
    %27 = vector.shape_cast %26 : vector<1x1x8xf32> to vector<1x8xf32>
    %cst_13 = arith.constant 1.000000e+00 : f32
    %28 = vector.broadcast %cst_13 : f32 to vector<1x8xf32>
    %29 = arith.subf %28, %27 : vector<1x8xf32>
    %cst_14 = arith.constant -1.000000e+09 : f32
    %30 = vector.broadcast %cst_14 : f32 to vector<1x8xf32>
    %31 = arith.mulf %29, %30 : vector<1x8xf32>
    %32 = arith.truncf %25 : vector<8x32xf32> to vector<8x32xbf16>
    %33 = arith.truncf %25 : vector<8x32xf32> to vector<8x32xbf16>
    %c0_15 = arith.constant 0 : index
    %c0_16 = arith.constant 0 : index
    %34 = vector.load %arg6[%c0_15, %c0_16] : memref<32x32xbf16, #tpu.memory_space<vmem>>, vector<32x32xbf16>
    %cst_17 = arith.constant dense<0.000000e+00> : vector<8x32xf32>
    %35 = tpu.matmul %33, %34, %cst_17 {dimension_numbers = #tpu.dot_dimension_numbers<[1], [0], [0], [1], [0, 0, 1, 1], [], []>} : vector<8x32xbf16>, vector<32x32xbf16>, vector<8x32xf32> -> vector<8x32xf32>
    %c0_18 = arith.constant 0 : index
    %c0_19 = arith.constant 0 : index
    %36 = vector.load %arg7[%c0_18, %c0_19] : memref<1x32xf32, #tpu.memory_space<vmem>>, vector<1x32xf32>
    %37 = vector.broadcast %36 : vector<1x32xf32> to vector<8x32xf32>
    %38 = arith.addf %35, %37 : vector<8x32xf32>
    %c0_20 = arith.constant 0 : index
    %c0_21 = arith.constant 0 : index
    %39 = vector.load %arg8[%c0_20, %c0_21] : memref<32x32xbf16, #tpu.memory_space<vmem>>, vector<32x32xbf16>
    %cst_22 = arith.constant dense<0.000000e+00> : vector<8x32xf32>
    %40 = tpu.matmul %32, %39, %cst_22 {dimension_numbers = #tpu.dot_dimension_numbers<[1], [0], [0], [1], [0, 0, 1, 1], [], []>} : vector<8x32xbf16>, vector<32x32xbf16>, vector<8x32xf32> -> vector<8x32xf32>
    %c0_23 = arith.constant 0 : index
    %c0_24 = arith.constant 0 : index
    %41 = vector.load %arg9[%c0_23, %c0_24] : memref<1x32xf32, #tpu.memory_space<vmem>>, vector<1x32xf32>
    %42 = vector.broadcast %41 : vector<1x32xf32> to vector<8x32xf32>
    %43 = arith.addf %40, %42 : vector<8x32xf32>
    %c0_25 = arith.constant 0 : index
    %c0_26 = arith.constant 0 : index
    %44 = vector.load %arg10[%c0_25, %c0_26] : memref<32x32xbf16, #tpu.memory_space<vmem>>, vector<32x32xbf16>
    %cst_27 = arith.constant dense<0.000000e+00> : vector<8x32xf32>
    %45 = tpu.matmul %32, %44, %cst_27 {dimension_numbers = #tpu.dot_dimension_numbers<[1], [0], [0], [1], [0, 0, 1, 1], [], []>} : vector<8x32xbf16>, vector<32x32xbf16>, vector<8x32xf32> -> vector<8x32xf32>
    %c0_28 = arith.constant 0 : index
    %c0_29 = arith.constant 0 : index
    %46 = vector.load %arg11[%c0_28, %c0_29] : memref<1x32xf32, #tpu.memory_space<vmem>>, vector<1x32xf32>
    %47 = vector.broadcast %46 : vector<1x32xf32> to vector<8x32xf32>
    %48 = arith.addf %45, %47 : vector<8x32xf32>
    %cst_30 = arith.constant 2.500000e-01 : f32
    %49 = vector.broadcast %cst_30 : f32 to vector<8x32xf32>
    %50 = arith.mulf %38, %49 : vector<8x32xf32>
    %51 = arith.truncf %50 : vector<8x32xf32> to vector<8x32xbf16>
    %52 = arith.truncf %43 : vector<8x32xf32> to vector<8x32xbf16>
    %53 = arith.truncf %48 : vector<8x32xf32> to vector<8x32xbf16>
    %54 = vector.extract_strided_slice %51 {offsets = [0, 0], sizes = [8, 16], strides = [1, 1]} : vector<8x32xbf16> to vector<8x16xbf16>
    %55 = vector.extract_strided_slice %52 {offsets = [0, 0], sizes = [8, 16], strides = [1, 1]} : vector<8x32xbf16> to vector<8x16xbf16>
    %cst_31 = arith.constant dense<0.000000e+00> : vector<8x8xf32>
    %56 = tpu.matmul %54, %55, %cst_31 {dimension_numbers = #tpu.dot_dimension_numbers<[1], [1], [0], [0], [0, 0, 1, 0], [], []>} : vector<8x16xbf16>, vector<8x16xbf16>, vector<8x8xf32> -> vector<8x8xf32>
    %57 = vector.broadcast %31 : vector<1x8xf32> to vector<8x8xf32>
    %58 = arith.addf %56, %57 : vector<8x8xf32>
    %cst_32 = arith.constant dense<0xFF800000> : vector<8xf32>
    %59 = vector.multi_reduction <maximumf>, %58, %cst_32 [1] : vector<8x8xf32> to vector<8xf32>
    %60 = vector.shape_cast %59 : vector<8xf32> to vector<8x1xf32>
    %61 = vector.broadcast %60 : vector<8x1xf32> to vector<8x8xf32>
    %62 = arith.subf %58, %61 : vector<8x8xf32>
    %63 = math.exp %62 : vector<8x8xf32>
    %cst_33 = arith.constant dense<0.000000e+00> : vector<8xf32>
    %64 = vector.multi_reduction <add>, %63, %cst_33 [1] : vector<8x8xf32> to vector<8xf32>
    %65 = vector.shape_cast %64 : vector<8xf32> to vector<8x1xf32>
    %66 = tpu.reciprocal %65 {approx = true} : vector<8x1xf32> -> vector<8x1xf32>
    %67 = vector.broadcast %66 : vector<8x1xf32> to vector<8x8xf32>
    %68 = arith.mulf %63, %67 : vector<8x8xf32>
    %69 = arith.truncf %68 : vector<8x8xf32> to vector<8x8xbf16>
    %70 = vector.extract_strided_slice %53 {offsets = [0, 0], sizes = [8, 16], strides = [1, 1]} : vector<8x32xbf16> to vector<8x16xbf16>
    %cst_34 = arith.constant dense<0.000000e+00> : vector<8x16xf32>
    %71 = tpu.matmul %69, %70, %cst_34 {dimension_numbers = #tpu.dot_dimension_numbers<[1], [0], [0], [1], [0, 0, 1, 1], [], []>} : vector<8x8xbf16>, vector<8x16xbf16>, vector<8x16xf32> -> vector<8x16xf32>
    %72 = arith.truncf %71 : vector<8x16xf32> to vector<8x16xbf16>
    %c0_35 = arith.constant 0 : index
    %c0_36 = arith.constant 0 : index
    %73 = vector.load %arg23[%c0_35, %c0_36] : memref<8x32xbf16, #tpu.memory_space<vmem>>, vector<8x16xbf16>
    tpu.vector_store %arg23[%c0_35, %c0_36], %72 {strides = array<i32>} : memref<8x32xbf16, #tpu.memory_space<vmem>>, vector<8x16xbf16>,
    %74 = vector.extract_strided_slice %51 {offsets = [0, 16], sizes = [8, 16], strides = [1, 1]} : vector<8x32xbf16> to vector<8x16xbf16>
    %75 = vector.extract_strided_slice %52 {offsets = [0, 16], sizes = [8, 16], strides = [1, 1]} : vector<8x32xbf16> to vector<8x16xbf16>
    %cst_37 = arith.constant dense<0.000000e+00> : vector<8x8xf32>
    %76 = tpu.matmul %74, %75, %cst_37 {dimension_numbers = #tpu.dot_dimension_numbers<[1], [1], [0], [0], [0, 0, 1, 0], [], []>} : vector<8x16xbf16>, vector<8x16xbf16>, vector<8x8xf32> -> vector<8x8xf32>
    %77 = vector.broadcast %31 : vector<1x8xf32> to vector<8x8xf32>
    %78 = arith.addf %76, %77 : vector<8x8xf32>
    %cst_38 = arith.constant dense<0xFF800000> : vector<8xf32>
    %79 = vector.multi_reduction <maximumf>, %78, %cst_38 [1] : vector<8x8xf32> to vector<8xf32>
    %80 = vector.shape_cast %79 : vector<8xf32> to vector<8x1xf32>
    %81 = vector.broadcast %80 : vector<8x1xf32> to vector<8x8xf32>
    %82 = arith.subf %78, %81 : vector<8x8xf32>
    %83 = math.exp %82 : vector<8x8xf32>
    %cst_39 = arith.constant dense<0.000000e+00> : vector<8xf32>
    %84 = vector.multi_reduction <add>, %83, %cst_39 [1] : vector<8x8xf32> to vector<8xf32>
    %85 = vector.shape_cast %84 : vector<8xf32> to vector<8x1xf32>
    %86 = tpu.reciprocal %85 {approx = true} : vector<8x1xf32> -> vector<8x1xf32>
    %87 = vector.broadcast %86 : vector<8x1xf32> to vector<8x8xf32>
    %88 = arith.mulf %83, %87 : vector<8x8xf32>
    %89 = arith.truncf %88 : vector<8x8xf32> to vector<8x8xbf16>
    %90 = vector.extract_strided_slice %53 {offsets = [0, 16], sizes = [8, 16], strides = [1, 1]} : vector<8x32xbf16> to vector<8x16xbf16>
    %cst_40 = arith.constant dense<0.000000e+00> : vector<8x16xf32>
    %91 = tpu.matmul %89, %90, %cst_40 {dimension_numbers = #tpu.dot_dimension_numbers<[1], [0], [0], [1], [0, 0, 1, 1], [], []>} : vector<8x8xbf16>, vector<8x16xbf16>, vector<8x16xf32> -> vector<8x16xf32>
    %92 = arith.truncf %91 : vector<8x16xf32> to vector<8x16xbf16>
    %c0_41 = arith.constant 0 : index
    %c16 = arith.constant 16 : index
    %93 = vector.load %arg23[%c0_41, %c16] : memref<8x32xbf16, #tpu.memory_space<vmem>>, vector<8x16xbf16>
    tpu.vector_store %arg23[%c0_41, %c16], %92 {strides = array<i32>} : memref<8x32xbf16, #tpu.memory_space<vmem>>, vector<8x16xbf16>,
    %c0_42 = arith.constant 0 : index
    %c0_43 = arith.constant 0 : index
    %94 = vector.load %arg23[%c0_42, %c0_43] : memref<8x32xbf16, #tpu.memory_space<vmem>>, vector<8x32xbf16>
    %c0_44 = arith.constant 0 : index
    %c0_45 = arith.constant 0 : index
    %95 = vector.load %arg12[%c0_44, %c0_45] : memref<32x32xbf16, #tpu.memory_space<vmem>>, vector<32x32xbf16>
    %cst_46 = arith.constant dense<0.000000e+00> : vector<8x32xf32>
    %96 = tpu.matmul %94, %95, %cst_46 {dimension_numbers = #tpu.dot_dimension_numbers<[1], [0], [0], [1], [0, 0, 1, 1], [], []>} : vector<8x32xbf16>, vector<32x32xbf16>, vector<8x32xf32> -> vector<8x32xf32>
    %c0_47 = arith.constant 0 : index
    %c0_48 = arith.constant 0 : index
    %97 = vector.load %arg13[%c0_47, %c0_48] : memref<1x32xf32, #tpu.memory_space<vmem>>, vector<1x32xf32>
    %98 = vector.broadcast %97 : vector<1x32xf32> to vector<8x32xf32>
    %99 = arith.addf %96, %98 : vector<8x32xf32>
    %100 = arith.addf %25, %99 : vector<8x32xf32>
    %c0_49 = arith.constant 0 : index
    %c0_50 = arith.constant 0 : index
    %101 = vector.load %arg14[%c0_49, %c0_50] : memref<1x32xf32, #tpu.memory_space<vmem>>, vector<1x32xf32>
    %c0_51 = arith.constant 0 : index
    %c0_52 = arith.constant 0 : index
    %102 = vector.load %arg15[%c0_51, %c0_52] : memref<1x32xf32, #tpu.memory_space<vmem>>, vector<1x32xf32>
    %cst_53 = arith.constant dense<0.000000e+00> : vector<8xf32>
    %103 = vector.multi_reduction <add>, %100, %cst_53 [1] : vector<8x32xf32> to vector<8xf32>
    %104 = vector.shape_cast %103 : vector<8xf32> to vector<8x1xf32>
    %cst_54 = arith.constant 3.200000e+01 : f32
    %105 = vector.broadcast %cst_54 : f32 to vector<8x1xf32>
    %106 = arith.divf %104, %105 : vector<8x1xf32>
    %107 = arith.mulf %100, %100 : vector<8x32xf32>
    %cst_55 = arith.constant dense<0.000000e+00> : vector<8xf32>
    %108 = vector.multi_reduction <add>, %107, %cst_55 [1] : vector<8x32xf32> to vector<8xf32>
    %109 = vector.shape_cast %108 : vector<8xf32> to vector<8x1xf32>
    %cst_56 = arith.constant 3.200000e+01 : f32
    %110 = vector.broadcast %cst_56 : f32 to vector<8x1xf32>
    %111 = arith.divf %109, %110 : vector<8x1xf32>
    %112 = arith.mulf %106, %106 : vector<8x1xf32>
    %113 = arith.subf %111, %112 : vector<8x1xf32>
    %114 = vector.broadcast %106 : vector<8x1xf32> to vector<8x32xf32>
    %115 = arith.subf %100, %114 : vector<8x32xf32>
    %cst_57 = arith.constant 9.99999996E-13 : f32
    %116 = vector.broadcast %cst_57 : f32 to vector<8x1xf32>
    %117 = arith.addf %113, %116 : vector<8x1xf32>
    %118 = math.rsqrt %117 : vector<8x1xf32>
    %119 = vector.broadcast %118 : vector<8x1xf32> to vector<8x32xf32>
    %120 = arith.mulf %115, %119 : vector<8x32xf32>
    %121 = vector.broadcast %101 : vector<1x32xf32> to vector<8x32xf32>
    %122 = arith.mulf %120, %121 : vector<8x32xf32>
    %123 = vector.broadcast %102 : vector<1x32xf32> to vector<8x32xf32>
    %124 = arith.addf %122, %123 : vector<8x32xf32>
    %125 = arith.truncf %124 : vector<8x32xf32> to vector<8x32xbf16>
    %c0_58 = arith.constant 0 : index
    %c0_59 = arith.constant 0 : index
    %126 = vector.load %arg16[%c0_58, %c0_59] : memref<32x64xbf16, #tpu.memory_space<vmem>>, vector<32x64xbf16>
    %cst_60 = arith.constant dense<0.000000e+00> : vector<8x64xf32>
    %127 = tpu.matmul %125, %126, %cst_60 {dimension_numbers = #tpu.dot_dimension_numbers<[1], [0], [0], [1], [0, 0, 1, 1], [], []>} : vector<8x32xbf16>, vector<32x64xbf16>, vector<8x64xf32> -> vector<8x64xf32>
    %c0_61 = arith.constant 0 : index
    %c0_62 = arith.constant 0 : index
    %128 = vector.load %arg17[%c0_61, %c0_62] : memref<1x64xf32, #tpu.memory_space<vmem>>, vector<1x64xf32>
    %129 = vector.broadcast %128 : vector<1x64xf32> to vector<8x64xf32>
    %130 = arith.addf %127, %129 : vector<8x64xf32>
    %131 = arith.mulf %130, %130 : vector<8x64xf32>
    %132 = arith.mulf %130, %131 : vector<8x64xf32>
    %cst_63 = arith.constant 4.471500e-02 : f32
    %133 = vector.broadcast %cst_63 : f32 to vector<8x64xf32>
    %134 = arith.mulf %133, %132 : vector<8x64xf32>
    %135 = arith.addf %130, %134 : vector<8x64xf32>
    %cst_64 = arith.constant 0.797884583 : f32
    %136 = vector.broadcast %cst_64 : f32 to vector<8x64xf32>
    %137 = arith.mulf %136, %135 : vector<8x64xf32>
    %138 = math.tanh %137 : vector<8x64xf32>
    %cst_65 = arith.constant 1.000000e+00 : f32
    %139 = vector.broadcast %cst_65 : f32 to vector<8x64xf32>
    %140 = arith.addf %139, %138 : vector<8x64xf32>
    %cst_66 = arith.constant 5.000000e-01 : f32
    %141 = vector.broadcast %cst_66 : f32 to vector<8x64xf32>
    %142 = arith.mulf %141, %140 : vector<8x64xf32>
    %143 = arith.mulf %130, %142 : vector<8x64xf32>
    %144 = arith.truncf %143 : vector<8x64xf32> to vector<8x64xbf16>
    %c0_67 = arith.constant 0 : index
    %c0_68 = arith.constant 0 : index
    %145 = vector.load %arg18[%c0_67, %c0_68] : memref<64x32xbf16, #tpu.memory_space<vmem>>, vector<64x32xbf16>
    %cst_69 = arith.constant dense<0.000000e+00> : vector<8x32xf32>
    %146 = tpu.matmul %144, %145, %cst_69 {dimension_numbers = #tpu.dot_dimension_numbers<[1], [0], [0], [1], [0, 0, 1, 1], [], []>} : vector<8x64xbf16>, vector<64x32xbf16>, vector<8x32xf32> -> vector<8x32xf32>
    %c0_70 = arith.constant 0 : index
    %c0_71 = arith.constant 0 : index
    %147 = vector.load %arg19[%c0_70, %c0_71] : memref<1x32xf32, #tpu.memory_space<vmem>>, vector<1x32xf32>
    %148 = vector.broadcast %147 : vector<1x32xf32> to vector<8x32xf32>
    %149 = arith.addf %146, %148 : vector<8x32xf32>
    %150 = arith.addf %124, %149 : vector<8x32xf32>
    %c0_72 = arith.constant 0 : index
    %c0_73 = arith.constant 0 : index
    %151 = vector.load %arg20[%c0_72, %c0_73] : memref<1x32xf32, #tpu.memory_space<vmem>>, vector<1x32xf32>
    %c0_74 = arith.constant 0 : index
    %c0_75 = arith.constant 0 : index
    %152 = vector.load %arg21[%c0_74, %c0_75] : memref<1x32xf32, #tpu.memory_space<vmem>>, vector<1x32xf32>
    %cst_76 = arith.constant dense<0.000000e+00> : vector<8xf32>
    %153 = vector.multi_reduction <add>, %150, %cst_76 [1] : vector<8x32xf32> to vector<8xf32>
    %154 = vector.shape_cast %153 : vector<8xf32> to vector<8x1xf32>
    %cst_77 = arith.constant 3.200000e+01 : f32
    %155 = vector.broadcast %cst_77 : f32 to vector<8x1xf32>
    %156 = arith.divf %154, %155 : vector<8x1xf32>
    %157 = arith.mulf %150, %150 : vector<8x32xf32>
    %cst_78 = arith.constant dense<0.000000e+00> : vector<8xf32>
    %158 = vector.multi_reduction <add>, %157, %cst_78 [1] : vector<8x32xf32> to vector<8xf32>
    %159 = vector.shape_cast %158 : vector<8xf32> to vector<8x1xf32>
    %cst_79 = arith.constant 3.200000e+01 : f32
    %160 = vector.broadcast %cst_79 : f32 to vector<8x1xf32>
    %161 = arith.divf %159, %160 : vector<8x1xf32>
    %162 = arith.mulf %156, %156 : vector<8x1xf32>
    %163 = arith.subf %161, %162 : vector<8x1xf32>
    %164 = vector.broadcast %156 : vector<8x1xf32> to vector<8x32xf32>
    %165 = arith.subf %150, %164 : vector<8x32xf32>
    %cst_80 = arith.constant 9.99999996E-13 : f32
    %166 = vector.broadcast %cst_80 : f32 to vector<8x1xf32>
    %167 = arith.addf %163, %166 : vector<8x1xf32>
    %168 = math.rsqrt %167 : vector<8x1xf32>
    %169 = vector.broadcast %168 : vector<8x1xf32> to vector<8x32xf32>
    %170 = arith.mulf %165, %169 : vector<8x32xf32>
    %171 = vector.broadcast %151 : vector<1x32xf32> to vector<8x32xf32>
    %172 = arith.mulf %170, %171 : vector<8x32xf32>
    %173 = vector.broadcast %152 : vector<1x32xf32> to vector<8x32xf32>
    %174 = arith.addf %172, %173 : vector<8x32xf32>
    %c0_81 = arith.constant 0 : index
    %c0_82 = arith.constant 0 : index
    %c0_83 = arith.constant 0 : index
    %175 = vector.load %arg22[%c0_81, %c0_82, %c0_83] : memref<1x8x32xf32, #tpu.memory_space<vmem>>, vector<1x8x32xf32>
    %176 = vector.shape_cast %175 : vector<1x8x32xf32> to vector<8x32xf32>
    %177 = vector.shape_cast %174 : vector<8x32xf32> to vector<1x8x32xf32>
    tpu.vector_store %arg22[%c0_81, %c0_82, %c0_83], %177 {strides = array<i32>} : memref<1x8x32xf32, #tpu.memory_space<vmem>>, vector<1x8x32xf32>,
    return
  }
  func.func @transform_0(%arg0: i32, %arg1: i32) -> (i32, i32, i32) {
    %c0_i32 = arith.constant 0 : i32
    %c0_i32_0 = arith.constant 0 : i32
    %c0_i32_1 = arith.constant 0 : i32
    return %arg0, %c0_i32, %c0_i32_0 : i32, i32, i32
  }
  func.func @transform_1(%arg0: i32, %arg1: i32) -> (i32, i32, i32) {
    %c0_i32 = arith.constant 0 : i32
    %c0_i32_0 = arith.constant 0 : i32
    %c0_i32_1 = arith.constant 0 : i32
    return %arg0, %c0_i32, %c0_i32_0 : i32, i32, i32
  }
  func.func @transform_2(%arg0: i32, %arg1: i32) -> (i32, i32) {
    %c0_i32 = arith.constant 0 : i32
    %c0_i32_0 = arith.constant 0 : i32
    %c0_i32_1 = arith.constant 0 : i32
    return %c0_i32, %c0_i32_0 : i32, i32
  }
  func.func @transform_3(%arg0: i32, %arg1: i32) -> (i32, i32) {
    %c0_i32 = arith.constant 0 : i32
    %c0_i32_0 = arith.constant 0 : i32
    %c0_i32_1 = arith.constant 0 : i32
    return %c0_i32, %c0_i32_0 : i32, i32
  }
  func.func @transform_4(%arg0: i32, %arg1: i32) -> (i32, i32) {
    %c0_i32 = arith.constant 0 : i32
    %c0_i32_0 = arith.constant 0 : i32
    %c0_i32_1 = arith.constant 0 : i32
    return %c0_i32, %c0_i32_0 : i32, i32
  }
  func.func @transform_5(%arg0: i32, %arg1: i32) -> (i32, i32) {
    %c0_i32 = arith.constant 0 : i32
    %c0_i32_0 = arith.constant 0 : i32
    %c0_i32_1 = arith.constant 0 : i32
    return %c0_i32, %c0_i32_0 : i32, i32
  }
  func.func @transform_6(%arg0: i32, %arg1: i32) -> (i32, i32) {
    %c0_i32 = arith.constant 0 : i32
    %c0_i32_0 = arith.constant 0 : i32
    %c0_i32_1 = arith.constant 0 : i32
    return %c0_i32, %c0_i32_0 : i32, i32
  }
  func.func @transform_7(%arg0: i32, %arg1: i32) -> (i32, i32) {
    %c0_i32 = arith.constant 0 : i32
    %c0_i32_0 = arith.constant 0 : i32
    %c0_i32_1 = arith.constant 0 : i32
    return %c0_i32, %c0_i32_0 : i32, i32
  }
  func.func @transform_8(%arg0: i32, %arg1: i32) -> (i32, i32) {
    %c0_i32 = arith.constant 0 : i32
    %c0_i32_0 = arith.constant 0 : i32
    %c0_i32_1 = arith.constant 0 : i32
    return %c0_i32, %c0_i32_0 : i32, i32
  }
  func.func @transform_9(%arg0: i32, %arg1: i32) -> (i32, i32) {
    %c0_i32 = arith.constant 0 : i32
    %c0_i32_0 = arith.constant 0 : i32
    %c0_i32_1 = arith.constant 0 : i32
    return %c0_i32, %c0_i32_0 : i32, i32
  }
  func.func @transform_10(%arg0: i32, %arg1: i32) -> (i32, i32) {
    %c0_i32 = arith.constant 0 : i32
    %c0_i32_0 = arith.constant 0 : i32
    %c0_i32_1 = arith.constant 0 : i32
    return %c0_i32, %c0_i32_0 : i32, i32
  }
  func.func @transform_11(%arg0: i32, %arg1: i32) -> (i32, i32) {
    %c0_i32 = arith.constant 0 : i32
    %c0_i32_0 = arith.constant 0 : i32
    %c0_i32_1 = arith.constant 0 : i32
    return %c0_i32, %c0_i32_0 : i32, i32
  }
  func.func @transform_12(%arg0: i32, %arg1: i32) -> (i32, i32) {
    %c0_i32 = arith.constant 0 : i32
    %c0_i32_0 = arith.constant 0 : i32
    %c0_i32_1 = arith.constant 0 : i32
    return %c0_i32, %c0_i32_0 : i32, i32
  }
  func.func @transform_13(%arg0: i32, %arg1: i32) -> (i32, i32) {
    %c0_i32 = arith.constant 0 : i32
    %c0_i32_0 = arith.constant 0 : i32
    %c0_i32_1 = arith.constant 0 : i32
    return %c0_i32, %c0_i32_0 : i32, i32
  }
  func.func @transform_14(%arg0: i32, %arg1: i32) -> (i32, i32) {
    %c0_i32 = arith.constant 0 : i32
    %c0_i32_0 = arith.constant 0 : i32
    %c0_i32_1 = arith.constant 0 : i32
    return %c0_i32, %c0_i32_0 : i32, i32
  }
  func.func @transform_15(%arg0: i32, %arg1: i32) -> (i32, i32) {
    %c0_i32 = arith.constant 0 : i32
    %c0_i32_0 = arith.constant 0 : i32
    %c0_i32_1 = arith.constant 0 : i32
    return %c0_i32, %c0_i32_0 : i32, i32
  }
  func.func @transform_16(%arg0: i32, %arg1: i32) -> (i32, i32) {
    %c0_i32 = arith.constant 0 : i32
    %c0_i32_0 = arith.constant 0 : i32
    %c0_i32_1 = arith.constant 0 : i32
    return %c0_i32, %c0_i32_0 : i32, i32
  }
  func.func @transform_17(%arg0: i32, %arg1: i32) -> (i32, i32) {
    %c0_i32 = arith.constant 0 : i32
    %c0_i32_0 = arith.constant 0 : i32
    %c0_i32_1 = arith.constant 0 : i32
    return %c0_i32, %c0_i32_0 : i32, i32
  }
  func.func @transform_18(%arg0: i32, %arg1: i32) -> (i32, i32) {
    %c0_i32 = arith.constant 0 : i32
    %c0_i32_0 = arith.constant 0 : i32
    %c0_i32_1 = arith.constant 0 : i32
    return %c0_i32, %c0_i32_0 : i32, i32
  }
  func.func @transform_19(%arg0: i32, %arg1: i32) -> (i32, i32) {
    %c0_i32 = arith.constant 0 : i32
    %c0_i32_0 = arith.constant 0 : i32
    %c0_i32_1 = arith.constant 0 : i32
    return %c0_i32, %c0_i32_0 : i32, i32
  }
  func.func @transform_20(%arg0: i32, %arg1: i32) -> (i32, i32, i32) {
    %c0_i32 = arith.constant 0 : i32
    %c0_i32_0 = arith.constant 0 : i32
    return %arg0, %arg1, %c0_i32 : i32, i32, i32
  }
}

</mosaic_0001>

<bundles_post_ra>
// kernel: tpu_custom_call.1
= control target key start
LH: loop header
LB: loop body
LE: loop exit
PB: predicated region body
PF: predicated region fallthrough
CT: control target
= control target key end

     0   :  { %s4017_s0 = inlined_call_operand.hbm [shape: f32[2,8,32], index: 0, kind: input, shape index: {}]   ;;  %s4018_s1 = inlined_call_operand.hbm [shape: f32[2,1,8], index: 1, kind: input, shape index: {}]   ;;  %s4019_s2 = inlined_call_operand.hbm [shape: f32[1,32], index: 2, kind: input, shape index: {}]   ;;  %s4020_s3 = inlined_call_operand.hbm [shape: f32[1,32], index: 3, kind: input, shape index: {}]   ;;  %s4021_s4 = inlined_call_operand.hbm [shape: bf16[32,32], index: 4, kind: input, shape index: {}]   ;;  %s4022_s5 = inlined_call_operand.hbm [shape: f32[1,32], index: 5, kind: input, shape index: {}]   ;;  %s4023_s6 = inlined_call_operand.hbm [shape: bf16[32,32], index: 6, kind: input, shape index: {}]   ;;  %s4024_s7 = inlined_call_operand.hbm [shape: f32[1,32], index: 7, kind: input, shape index: {}]   ;;  %s4025_s8 = inlined_call_operand.hbm [shape: bf16[32,32], index: 8, kind: input, shape index: {}]   ;;  %s4026_s9 = inlined_call_operand.hbm [shape: f32[1,32], index: 9, kind: input, shape index: {}]   ;;  %s4027_s10 = inlined_call_operand.hbm [shape: bf16[32,32], index: 10, kind: input, shape index: {}]   ;;  %s4028_s11 = inlined_call_operand.hbm [shape: f32[1,32], index: 11, kind: input, shape index: {}]   ;;  %s4029_s12 = inlined_call_operand.hbm [shape: f32[1,32], index: 12, kind: input, shape index: {}]   ;;  %s4030_s13 = inlined_call_operand.hbm [shape: f32[1,32], index: 13, kind: input, shape index: {}]   ;;  %s4031_s14 = inlined_call_operand.hbm [shape: bf16[32,64], index: 14, kind: input, shape index: {}]   ;;  %s4032_s15 = inlined_call_operand.hbm [shape: f32[1,64], index: 15, kind: input, shape index: {}]   ;;  %s4033_s16 = inlined_call_operand.hbm [shape: bf16[64,32], index: 16, kind: input, shape index: {}]   ;;  %s4034_s17 = inlined_call_operand.hbm [shape: f32[1,32], index: 17, kind: input, shape index: {}]   ;;  %s4035_s18 = inlined_call_operand.hbm [shape: f32[1,32], index: 18, kind: input, shape index: {}]   ;;  %s4036_s19 = inlined_call_operand.hbm [shape: f32[1,32], index: 19, kind: input, shape index: {}]   ;;  %s4037_s20 = inlined_call_operand.hbm [shape: f32[2,8,32], index: 20, kind: output, shape index: {}]  }
   0x1   :  { %4060 = sst [smem:[#allocation56_spill]] %s4017_s0 }
   0x2   :  { %4061 = sst [smem:[#allocation57_spill]] %s4018_s1 }
   0x3   :  { %4062 = sst [smem:[#allocation58_spill]] %s4019_s2 }
   0x4   :  { %4063 = sst [smem:[#allocation59_spill]] %s4020_s3 }
   0x5   :  { %4064 = sst [smem:[#allocation60_spill]] %s4021_s4 }
   0x6   :  { %4065 = sst [smem:[#allocation61_spill]] %s4022_s5 }
   0x7   :  { %4066 = sst [smem:[#allocation62_spill]] %s4023_s6 }
   0x8   :  { %4067 = sst [smem:[#allocation63_spill]] %s4024_s7 }
   0x9   :  { %4068 = sst [smem:[#allocation64_spill]] %s4025_s8 }
   0xa   :  { %4069 = sst [smem:[#allocation65_spill]] %s4026_s9 }
   0xb   :  { %4070 = sst [smem:[#allocation66_spill]] %s4027_s10 }
   0xc   :  { %4071 = sst [smem:[#allocation67_spill]] %s4028_s11 }
   0xd   :  { %4072 = sst [smem:[#allocation68_spill]] %s4036_s19 }
   0xe   :  { %4073 = sst [smem:[#allocation69_spill]] %s4037_s20 }
   0xf   :  { %25 = vsyncpa [#allocation4], 0 }
  0x10   :  { %27 = vsyncpa [#allocation4 + $0x1], 0 }
  0x11   :  { %28 = vsyncpa [#allocation7], 0 }
  0x12   :  { %30 = vsyncpa [#allocation7 + $0x1], 0 }
  0x13   :  { %31 = vsyncpa [#allocation10], 0 }
  0x14   :  { %32 = vsyncpa [#allocation13], 0 }
  0x15   :  { %33 = vsyncpa [#allocation16], 0 }
  0x16   :  { %34 = vsyncpa [#allocation19], 0 }
  0x17   :  { %35 = vsyncpa [#allocation22], 0 }
  0x18   :  { %36 = vsyncpa [#allocation25], 0 }
  0x19   :  { %37 = vsyncpa [#allocation28], 0 }
  0x1a   :  { %38 = vsyncpa [#allocation31], 0 }
  0x1b   :  { %39 = vsyncpa [#allocation34], 0 }
  0x1c   :  { %40 = vsyncpa [#allocation5], 0 }
  0x1d   :  { %42 = vsyncpa [#allocation5 + $0x1], 0  ;;  %s3280_s1 = smov 0   ;;  %s3282_s22 = smov 0  }
  0x1e   :  { %s3284_s23 = smov 0   ;;  %s3286_s24 = smov 0  }
  0x1f   :  { %s3288_s2 = smov 0   ;;  %s3290_s25 = smov 0  }
  0x20 LB: > { %4074 = sst [smem:[#allocation49_spill]] %s3126_s1  ;;  %s3311_s3 = sadd.s32 4294967295, %s3146_s25   ;;  %s3146_s25 = sphi %s3290_s25, %s48_s25   ;;  %s3142_s2 = sphi %s3288_s2, %s4148_s2   ;;  %s3138_s24 = sphi %s3286_s24, %s4145_s24   ;;  %s3134_s23 = sphi %s3284_s23, %s4147_s23   ;;  %s3130_s22 = sphi %s3282_s22, %s4144_s22   ;;  %s3126_s1 = sphi %s3280_s1, %s4143_s1  }
  0x21   : > { %4075 = sst [smem:[#allocation50_spill]] %s3130_s22  ;;  %p1982_p0 = scmp.ge.s32.totalorder %s3146_s25, 1 }
  0x22   : > { %4076 = sst [smem:[#allocation51_spill]] %s3134_s23  ;;  %p4050_p1 = scmp.eq.s32.totalorder %s3311_s3, 0 }
  0x23   : > { %4077 = sst [smem:[#allocation52_spill]] %s3138_s24  ;;  %p523_p2 = scmp.lt.s32.totalorder %s3146_s25, 3 }
  0x24   : > { %4078 = sst [smem:[#allocation53_spill]] %s3142_s2  ;;  %s3148_s27 = smov [#allocation8]  }
  0x25   : > { %4079 = sst [smem:[#allocation54_spill]] %s3311_s3  ;;  %p3316_p3 = pnand %p1982_p0, %p523_p2 }
  0x26   : > { %s536_s28 = sshll.u32 %s3148_s27, 4  ;;  %s3149_s4 = smov [#allocation9]   ;;  %s537_s28 = int_to_ptr.vmem [resolvable:$true] %s536_s28 }
  0x27   : > { %s4080_s26 = scalar_select %p3316_p3, 1, 0 }
  0x28   : > { %p2250_p5 = pneg %p3316_p3  ;;  %s547_s29 = sshll.u32 %s3149_s4, 4  ;;  %s3329_s29 = int_to_ptr.vmem [resolvable:$true] %s547_s29 }
  0x29   : > { %4081 = sst [smem:[#allocation55_spill]] %s4080_s26  ;;  %s3150_s0 = smov [#allocation12]  }
  0x2a   : > { %p3325_p6 = pnand %p2250_p5, %p4050_p1  ;;  %s571_s21 = sshll.u32 %s3150_s0, 4  ;;  %s3331_s21 = int_to_ptr.vmem [resolvable:$true] %s571_s21 }
  0x2b   : > { %s4083_s24 = sld [smem:[#allocation58_spill]] }
  0x2c   : > { %p3341_p8 = pneg %p3325_p6 }
  0x31   : > { %s4084_s19 = smov %s4083_s24  ;;  %s2456_s1 = scalar_lea.hbm %s4083_s24, 16 }
  0x32   : > { %p2457_p7 = scmp.ne.s32.totalorder %s4084_s19, %s2456_s1  ;;  %p2463_p11 = scmp.lt.u32.totalorder %s2456_s1, %s4084_s19 }
  0x34   : > { %p2459_p9 = pnand %p3341_p8, %p2457_p7 }
  0x36   : > { %p2460_p10 = pneg %p2459_p9 }
  0x38   : > { %p2465_p12 = pnand %p2463_p11, %p2460_p10 }
  0x3a   : > { %2468 = shalt.err (!%p2465_p12)
}
  0x3b   : > { %s2469_s20 = scalar_lea.vmem %s537_s28, 16  ;;  %s2476_s22 = scalar_lea.vmem %s537_s28, 32 }
  0x3c   : > { %p2470_p13 = scmp.ne.s32.totalorder %s537_s28, %s2469_s20  ;;  %p2477_p5 = scmp.lt.s32.totalorder %s537_s28, %s537_s28 }
  0x3d   : > { %p2478_p4 = scmp.lt.s32.totalorder %s2476_s22, %s2469_s20 }
  0x3e   : > { %p2472_p0 = pnand %p2470_p13, %p3341_p8 }
  0x3f   : > { %p2479_p1 = por %p2478_p4, %p2477_p5 }
  0x40   : > { %p2473_p2 = pneg %p2472_p0 }
  0x42   : > { %p2480_p3 = pnand %p2479_p1, %p2473_p2 }
  0x44   : > { %2483 = shalt.err (!%p2480_p3)
}
  0x45   : > { %2253 = dma.hbm_to_vmem [thread:$0]  (!%p3325_p6), %s4084_s19, 16, %s537_s28, [#allocation7]  }
  0x46   : > { %s4086_s27 = sld [smem:[#allocation59_spill]] }
  0x4c   : > { %s2484_s0 = scalar_lea.hbm %s4086_s27, 16 }
  0x4d   : > { %p2485_p7 = scmp.ne.s32.totalorder %s4086_s27, %s2484_s0  ;;  %p2491_p1 = scmp.lt.u32.totalorder %s2484_s0, %s4086_s27 }
  0x4f   : > { %p2487_p9 = pnand %p2485_p7, %p3341_p8 }
  0x51   : > { %p2488_p4 = pneg %p2487_p9 }
  0x53   : > { %p2493_p3 = pnand %p2491_p1, %p2488_p4 }
  0x55   : > { %2496 = shalt.err (!%p2493_p3)
}
  0x56   : > { %s2497_s28 = scalar_lea.vmem %s3329_s29, 16  ;;  %s2504_s23 = scalar_lea.vmem %s3329_s29, 32 }
  0x57   : > { %p2498_p10 = scmp.ne.s32.totalorder %s3329_s29, %s2497_s28  ;;  %p2505_p13 = scmp.lt.s32.totalorder %s3329_s29, %s3329_s29 }
  0x58   : > { %p2506_p0 = scmp.lt.s32.totalorder %s2504_s23, %s2497_s28 }
  0x59   : > { %p2500_p11 = pnand %p2498_p10, %p3341_p8 }
  0x5a   : > { %p2507_p2 = por %p2506_p0, %p2505_p13 }
  0x5b   : > { %p2501_p12 = pneg %p2500_p11 }
  0x5d   : > { %p2508_p5 = pnand %p2507_p2, %p2501_p12 }
  0x5f   : > { %2511 = shalt.err (!%p2508_p5)
}
  0x60   : > { %2256 = dma.hbm_to_vmem [thread:$0]  (!%p3325_p6), %s4086_s27, 16, %s3329_s29, [#allocation10]  }
  0x61   : > { %s4087_s5 = sld [smem:[#allocation61_spill]] }
  0x67   : > { %s2512_s3 = scalar_lea.hbm %s4087_s5, 16 }
  0x68   : > { %p2513_p7 = scmp.ne.s32.totalorder %s4087_s5, %s2512_s3  ;;  %p2519_p1 = scmp.lt.u32.totalorder %s2512_s3, %s4087_s5 }
  0x6a   : > { %p2515_p9 = pnand %p2513_p7, %p3341_p8 }
  0x6c   : > { %p2516_p4 = pneg %p2515_p9 }
  0x6e   : > { %p2521_p3 = pnand %p2519_p1, %p2516_p4 }
  0x70   : > { %2524 = shalt.err (!%p2521_p3)
}
  0x71   : > { %s2525_s29 = scalar_lea.vmem %s3331_s21, 16  ;;  %s2532_s23 = scalar_lea.vmem %s3331_s21, 32 }
  0x72   : > { %p2526_p10 = scmp.ne.s32.totalorder %s3331_s21, %s2525_s29  ;;  %p2533_p13 = scmp.lt.s32.totalorder %s3331_s21, %s3331_s21 }
  0x73   : > { %p2534_p0 = scmp.lt.s32.totalorder %s2532_s23, %s2525_s29 }
  0x74   : > { %p2528_p11 = pnand %p2526_p10, %p3341_p8 }
  0x75   : > { %p2535_p2 = por %p2534_p0, %p2533_p13 }
  0x76   : > { %p2529_p12 = pneg %p2528_p11 }
  0x78   : > { %p2536_p5 = pnand %p2535_p2, %p2529_p12 }
  0x7a   : > { %2539 = shalt.err (!%p2536_p5)
}
  0x7b   : > { %2262 = dma.hbm_to_vmem [thread:$0]  (!%p3325_p6), %s4087_s5, 16, %s3331_s21, [#allocation13]  }
  0x7c   : > { %s3151_s26 = smov [#allocation15]   ;;  %s3152_s3 = smov [#allocation18]  }
  0x7d   : > { %s595_s1 = sshll.u32 %s3151_s26, 4  ;;  %s619_s0 = sshll.u32 %s3152_s3, 4  ;;  %s596_s1 = int_to_ptr.vmem [resolvable:$true] %s595_s1  ;;  %s620_s0 = int_to_ptr.vmem [resolvable:$true] %s619_s0 }
  0x7e   : > { %s4088_s7 = sld [smem:[#allocation63_spill]] }
  0x84   : > { %s2540_s28 = scalar_lea.hbm %s4088_s7, 16 }
  0x85   : > { %p2541_p7 = scmp.ne.s32.totalorder %s4088_s7, %s2540_s28  ;;  %p2547_p1 = scmp.lt.u32.totalorder %s2540_s28, %s4088_s7 }
  0x87   : > { %p2543_p9 = pnand %p2541_p7, %p3341_p8 }
  0x89   : > { %p2544_p4 = pneg %p2543_p9 }
  0x8b   : > { %p2549_p3 = pnand %p2547_p1, %p2544_p4 }
  0x8d   : > { %2552 = shalt.err (!%p2549_p3)
}
  0x8e   : > { %s2553_s21 = scalar_lea.vmem %s596_s1, 16  ;;  %s2560_s24 = scalar_lea.vmem %s596_s1, 32 }
  0x8f   : > { %p2554_p10 = scmp.ne.s32.totalorder %s596_s1, %s2553_s21  ;;  %p2561_p13 = scmp.lt.s32.totalorder %s596_s1, %s596_s1 }
  0x90   : > { %p2562_p0 = scmp.lt.s32.totalorder %s2560_s24, %s2553_s21 }
  0x91   : > { %p2556_p11 = pnand %p2554_p10, %p3341_p8 }
  0x92   : > { %p2563_p2 = por %p2562_p0, %p2561_p13 }
  0x93   : > { %p2557_p12 = pneg %p2556_p11 }
  0x95   : > { %p2564_p5 = pnand %p2563_p2, %p2557_p12 }
  0x97   : > { %2567 = shalt.err (!%p2564_p5)
}
  0x98   : > { %2268 = dma.hbm_to_vmem [thread:$0]  (!%p3325_p6), %s4088_s7, 16, %s596_s1, [#allocation16]  }
  0x99   : > { %s4089_s9 = sld [smem:[#allocation65_spill]] }
  0x9f   : > { %s2568_s22 = scalar_lea.hbm %s4089_s9, 16 }
  0xa0   : > { %p2569_p7 = scmp.ne.s32.totalorder %s4089_s9, %s2568_s22  ;;  %p2575_p1 = scmp.lt.u32.totalorder %s2568_s22, %s4089_s9 }
  0xa2   : > { %p2571_p9 = pnand %p2569_p7, %p3341_p8 }
  0xa4   : > { %p2572_p4 = pneg %p2571_p9 }
  0xa6   : > { %p2577_p3 = pnand %p2575_p1, %p2572_p4 }
  0xa8   : > { %2580 = shalt.err (!%p2577_p3)
}
  0xa9   : > { %s2581_s21 = scalar_lea.vmem %s620_s0, 16  ;;  %s2588_s1 = scalar_lea.vmem %s620_s0, 32 }
  0xaa   : > { %p2582_p10 = scmp.ne.s32.totalorder %s620_s0, %s2581_s21  ;;  %p2589_p13 = scmp.lt.s32.totalorder %s620_s0, %s620_s0 }
  0xab   : > { %p2590_p0 = scmp.lt.s32.totalorder %s2588_s1, %s2581_s21 }
  0xac   : > { %p2584_p11 = pnand %p2582_p10, %p3341_p8 }
  0xad   : > { %p2591_p2 = por %p2590_p0, %p2589_p13 }
  0xae   : > { %p2585_p12 = pneg %p2584_p11 }
  0xb0   : > { %p2592_p5 = pnand %p2591_p2, %p2585_p12 }
  0xb2   : > { %2595 = shalt.err (!%p2592_p5)
}
  0xb3   : > { %2274 = dma.hbm_to_vmem [thread:$0]  (!%p3325_p6), %s4089_s9, 16, %s620_s0, [#allocation19]  }
  0xb4   : > { %s3153_s3 = smov [#allocation21]   ;;  %s3154_s20 = smov [#allocation24]  }
  0xb5   : > { %s643_s19 = sshll.u32 %s3153_s3, 4  ;;  %s665_s22 = sshll.u32 %s3154_s20, 4  ;;  %s644_s19 = int_to_ptr.vmem [resolvable:$true] %s643_s19  ;;  %s666_s22 = int_to_ptr.vmem [resolvable:$true] %s665_s22 }
  0xb6   : > { %s4090_s11 = sld [smem:[#allocation67_spill]] }
  0xbc   : > { %s2596_s23 = scalar_lea.hbm %s4090_s11, 16 }
  0xbd   : > { %p2597_p7 = scmp.ne.s32.totalorder %s4090_s11, %s2596_s23  ;;  %p2603_p1 = scmp.lt.u32.totalorder %s2596_s23, %s4090_s11 }
  0xbf   : > { %p2599_p9 = pnand %p2597_p7, %p3341_p8 }
  0xc1   : > { %p2600_p4 = pneg %p2599_p9 }
  0xc3   : > { %p2605_p3 = pnand %p2603_p1, %p2600_p4 }
  0xc5   : > { %2608 = shalt.err (!%p2605_p3)
}
  0xc6   : > { %s2609_s0 = scalar_lea.vmem %s644_s19, 16  ;;  %s2616_s26 = scalar_lea.vmem %s644_s19, 32 }
  0xc7   : > { %p2610_p10 = scmp.ne.s32.totalorder %s644_s19, %s2609_s0  ;;  %p2617_p13 = scmp.lt.s32.totalorder %s644_s19, %s644_s19 }
  0xc8   : > { %p2618_p0 = scmp.lt.s32.totalorder %s2616_s26, %s2609_s0 }
  0xc9   : > { %p2612_p11 = pnand %p2610_p10, %p3341_p8 }
  0xca   : > { %p2619_p2 = por %p2618_p0, %p2617_p13 }
  0xcb   : > { %p2613_p12 = pneg %p2612_p11 }
  0xcd   : > { %p2620_p5 = pnand %p2619_p2, %p2613_p12 }
  0xcf   : > { %2623 = shalt.err (!%p2620_p5)
}
  0xd0   : > { %2280 = dma.hbm_to_vmem [thread:$0]  (!%p3325_p6), %s4090_s11, 16, %s644_s19, [#allocation22]  }
  0xd1   : > { %s2624_s23 = scalar_lea.hbm %s4030_s13, 16 }
  0xd2   : > { %p2625_p7 = scmp.ne.s32.totalorder %s4030_s13, %s2624_s23  ;;  %p2631_p1 = scmp.lt.u32.totalorder %s2624_s23, %s4030_s13 }
  0xd4   : > { %p2627_p9 = pnand %p2625_p7, %p3341_p8 }
  0xd6   : > { %p2628_p4 = pneg %p2627_p9 }
  0xd8   : > { %p2633_p3 = pnand %p2631_p1, %p2628_p4 }
  0xda   : > { %2636 = shalt.err (!%p2633_p3)
}
  0xdb   : > { %s2637_s0 = scalar_lea.vmem %s666_s22, 16  ;;  %s2644_s19 = scalar_lea.vmem %s666_s22, 32 }
  0xdc   : > { %p2638_p10 = scmp.ne.s32.totalorder %s666_s22, %s2637_s0  ;;  %p2645_p13 = scmp.lt.s32.totalorder %s666_s22, %s666_s22 }
  0xdd   : > { %p2646_p0 = scmp.lt.s32.totalorder %s2644_s19, %s2637_s0 }
  0xde   : > { %p2640_p11 = pnand %p2638_p10, %p3341_p8 }
  0xdf   : > { %p2647_p2 = por %p2646_p0, %p2645_p13 }
  0xe0   : > { %p2641_p12 = pneg %p2640_p11 }
  0xe2   : > { %p2648_p5 = pnand %p2647_p2, %p2641_p12 }
  0xe4   : > { %2651 = shalt.err (!%p2648_p5)
}
  0xe5   : > { %2286 = dma.hbm_to_vmem [thread:$0]  (!%p3325_p6), %s4030_s13, 16, %s666_s22, [#allocation25]  }
  0xe6   : > { %s3155_s20 = smov [#allocation27]   ;;  %s3156_s29 = smov [#allocation30]  }
  0xe7   : > { %s689_s28 = sshll.u32 %s3155_s20, 4  ;;  %s713_s23 = sshll.u32 %s3156_s29, 4  ;;  %s690_s28 = int_to_ptr.vmem [resolvable:$true] %s689_s28  ;;  %s714_s23 = int_to_ptr.vmem [resolvable:$true] %s713_s23 }
  0xe8   : > { %s2652_s1 = scalar_lea.hbm %s4032_s15, 16 }
  0xe9   : > { %p2653_p7 = scmp.ne.s32.totalorder %s4032_s15, %s2652_s1  ;;  %p2659_p1 = scmp.lt.u32.totalorder %s2652_s1, %s4032_s15 }
  0xeb   : > { %p2655_p9 = pnand %p2653_p7, %p3341_p8 }
  0xed   : > { %p2656_p4 = pneg %p2655_p9 }
  0xef   : > { %p2661_p3 = pnand %p2659_p1, %p2656_p4 }
  0xf1   : > { %2664 = shalt.err (!%p2661_p3)
}
  0xf2   : > { %s2665_s22 = scalar_lea.vmem %s690_s28, 16  ;;  %s2672_s3 = scalar_lea.vmem %s690_s28, 32 }
  0xf3   : > { %p2666_p10 = scmp.ne.s32.totalorder %s690_s28, %s2665_s22  ;;  %p2673_p13 = scmp.lt.s32.totalorder %s690_s28, %s690_s28 }
  0xf4   : > { %p2674_p0 = scmp.lt.s32.totalorder %s2672_s3, %s2665_s22 }
  0xf5   : > { %p2668_p11 = pnand %p2666_p10, %p3341_p8 }
  0xf6   : > { %p2675_p2 = por %p2674_p0, %p2673_p13 }
  0xf7   : > { %p2669_p12 = pneg %p2668_p11 }
  0xf9   : > { %p2676_p5 = pnand %p2675_p2, %p2669_p12 }
  0xfb   : > { %2679 = shalt.err (!%p2676_p5)
}
  0xfc   : > { %2292 = dma.hbm_to_vmem [thread:$0]  (!%p3325_p6), %s4032_s15, 16, %s690_s28, [#allocation28]  }
  0xfd   : > { %s2680_s1 = scalar_lea.hbm %s4034_s17, 16 }
  0xfe   : > { %p2681_p7 = scmp.ne.s32.totalorder %s4034_s17, %s2680_s1  ;;  %p2687_p1 = scmp.lt.u32.totalorder %s2680_s1, %s4034_s17 }
 0x100   : > { %p2683_p9 = pnand %p2681_p7, %p3341_p8 }
 0x102   : > { %p2684_p4 = pneg %p2683_p9 }
 0x104   : > { %p2689_p3 = pnand %p2687_p1, %p2684_p4 }
 0x106   : > { %2692 = shalt.err (!%p2689_p3)
}
 0x107   : > { %s2693_s22 = scalar_lea.vmem %s714_s23, 16  ;;  %s2700_s28 = scalar_lea.vmem %s714_s23, 32 }
 0x108   : > { %p2694_p10 = scmp.ne.s32.totalorder %s714_s23, %s2693_s22  ;;  %p2701_p13 = scmp.lt.s32.totalorder %s714_s23, %s714_s23 }
 0x109   : > { %p2702_p0 = scmp.lt.s32.totalorder %s2700_s28, %s2693_s22 }
 0x10a   : > { %p2696_p11 = pnand %p2694_p10, %p3341_p8 }
 0x10b   : > { %p2703_p2 = por %p2702_p0, %p2701_p13 }
 0x10c   : > { %p2697_p12 = pneg %p2696_p11 }
 0x10e   : > { %p2704_p5 = pnand %p2703_p2, %p2697_p12 }
 0x110   : > { %2707 = shalt.err (!%p2704_p5)
}
 0x111   : > { %2298 = dma.hbm_to_vmem [thread:$0]  (!%p3325_p6), %s4034_s17, 16, %s714_s23, [#allocation31]  }
 0x112   : > { %s3157_s29 = smov [#allocation11]   ;;  %s4091_s24 = sld [smem:[#allocation60_spill]] }
 0x113   : > { %s557_s2 = sshll.u32 %s3157_s29, 4  ;;  %s558_s2 = int_to_ptr.vmem [resolvable:$true] %s557_s2 }
 0x118   : > { %s4092_s0 = smov %s4091_s24  ;;  %s2708_s19 = scalar_lea.hbm %s4091_s24, 256 }
 0x119   : > { %p2709_p7 = scmp.ne.s32.totalorder %s4092_s0, %s2708_s19  ;;  %p2715_p1 = scmp.lt.u32.totalorder %s2708_s19, %s4092_s0 }
 0x11b   : > { %p2711_p9 = pnand %p2709_p7, %p3341_p8 }
 0x11d   : > { %p2712_p4 = pneg %p2711_p9 }
 0x11f   : > { %p2717_p3 = pnand %p2715_p1, %p2712_p4 }
 0x121   : > { %2720 = shalt.err (!%p2717_p3)
}
 0x122   : > { %s2721_s23 = scalar_lea.vmem %s558_s2, 256  ;;  %p2729_p13 = scmp.lt.s32.totalorder %s558_s2, %s558_s2 }
 0x123   : > { %p2722_p10 = scmp.ne.s32.totalorder %s558_s2, %s2721_s23  ;;  %p2730_p0 = scmp.lt.s32.totalorder %s2721_s23, %s2721_s23 }
 0x125   : > { %p2724_p11 = pnand %p2722_p10, %p3341_p8  ;;  %p2731_p2 = por %p2730_p0, %p2729_p13 }
 0x127   : > { %p2725_p12 = pneg %p2724_p11 }
 0x129   : > { %p2732_p5 = pnand %p2731_p2, %p2725_p12 }
 0x12b   : > { %2735 = shalt.err (!%p2732_p5)
}
 0x12c   : > { %s3158_s5 = smov 64   ;;  %s3159_s3 = smov 4  }
 0x12d   : > { %2259 = dma.hbm_to_vmem [thread:$0]  (!%p3325_p6), %s4092_s0, 256, %s558_s2, [#allocation10], %s3158_s5, %s3158_s5, %s3159_s3  }
 0x12e   : > { %s3160_s21 = smov [#allocation14]   ;;  %s3161_s24 = smov [#allocation17]  }
 0x12f   : > { %s581_s1 = sshll.u32 %s3160_s21, 4  ;;  %s605_s19 = sshll.u32 %s3161_s24, 4  ;;  %s582_s1 = int_to_ptr.vmem [resolvable:$true] %s581_s1  ;;  %s3534_s19 = int_to_ptr.vmem [resolvable:$true] %s605_s19 }
 0x130   : > { %s4093_s6 = sld [smem:[#allocation62_spill]] }
 0x136   : > { %s2736_s28 = scalar_lea.hbm %s4093_s6, 256 }
 0x137   : > { %p2737_p7 = scmp.ne.s32.totalorder %s4093_s6, %s2736_s28  ;;  %p2743_p1 = scmp.lt.u32.totalorder %s2736_s28, %s4093_s6 }
 0x139   : > { %p2739_p9 = pnand %p2737_p7, %p3341_p8 }
 0x13b   : > { %p2740_p4 = pneg %p2739_p9 }
 0x13d   : > { %p2745_p3 = pnand %p2743_p1, %p2740_p4 }
 0x13f   : > { %2748 = shalt.err (!%p2745_p3)
}
 0x140   : > { %s2749_s29 = scalar_lea.vmem %s582_s1, 256  ;;  %p2757_p13 = scmp.lt.s32.totalorder %s582_s1, %s582_s1 }
 0x141   : > { %p2750_p10 = scmp.ne.s32.totalorder %s582_s1, %s2749_s29  ;;  %p2758_p0 = scmp.lt.s32.totalorder %s2749_s29, %s2749_s29 }
 0x143   : > { %p2752_p11 = pnand %p2750_p10, %p3341_p8  ;;  %p2759_p2 = por %p2758_p0, %p2757_p13 }
 0x145   : > { %p2753_p12 = pneg %p2752_p11 }
 0x147   : > { %p2760_p5 = pnand %p2759_p2, %p2753_p12 }
 0x149   : > { %2763 = shalt.err (!%p2760_p5)
}
 0x14a   : > { %2265 = dma.hbm_to_vmem [thread:$0]  (!%p3325_p6), %s4093_s6, 256, %s582_s1, [#allocation13], %s3158_s5, %s3158_s5, %s3159_s3  }
 0x14b   : > { %s4094_s8 = sld [smem:[#allocation64_spill]] }
 0x151   : > { %s2764_s22 = scalar_lea.hbm %s4094_s8, 256 }
 0x152   : > { %p2765_p7 = scmp.ne.s32.totalorder %s4094_s8, %s2764_s22  ;;  %p2771_p1 = scmp.lt.u32.totalorder %s2764_s22, %s4094_s8 }
 0x154   : > { %p2767_p9 = pnand %p2765_p7, %p3341_p8 }
 0x156   : > { %p2768_p4 = pneg %p2767_p9 }
 0x158   : > { %p2773_p3 = pnand %p2771_p1, %p2768_p4 }
 0x15a   : > { %2776 = shalt.err (!%p2773_p3)
}
 0x15b   : > { %s2777_s1 = scalar_lea.vmem %s3534_s19, 256  ;;  %p2785_p13 = scmp.lt.s32.totalorder %s3534_s19, %s3534_s19 }
 0x15c   : > { %p2778_p10 = scmp.ne.s32.totalorder %s3534_s19, %s2777_s1  ;;  %p2786_p0 = scmp.lt.s32.totalorder %s2777_s1, %s2777_s1 }
 0x15e   : > { %p2780_p11 = pnand %p2778_p10, %p3341_p8  ;;  %p2787_p2 = por %p2786_p0, %p2785_p13 }
 0x160   : > { %p2781_p12 = pneg %p2780_p11 }
 0x162   : > { %p2788_p5 = pnand %p2787_p2, %p2781_p12 }
 0x164   : > { %2791 = shalt.err (!%p2788_p5)
}
 0x165   : > { %2271 = dma.hbm_to_vmem [thread:$0]  (!%p3325_p6), %s4094_s8, 256, %s3534_s19, [#allocation16], %s3158_s5, %s3158_s5, %s3159_s3  }
 0x166   : > { %s3162_s21 = smov [#allocation20]   ;;  %s3163_s26 = smov [#allocation23]  }
 0x167   : > { %s629_s24 = sshll.u32 %s3162_s21, 4  ;;  %s654_s22 = sshll.u32 %s3163_s26, 4  ;;  %s630_s24 = int_to_ptr.vmem [resolvable:$true] %s629_s24  ;;  %s3583_s22 = int_to_ptr.vmem [resolvable:$true] %s654_s22 }
 0x168   : > { %s4095_s10 = sld [smem:[#allocation66_spill]] }
 0x16e   : > { %s2792_s20 = scalar_lea.hbm %s4095_s10, 256 }
 0x16f   : > { %p2793_p7 = scmp.ne.s32.totalorder %s4095_s10, %s2792_s20  ;;  %p2799_p1 = scmp.lt.u32.totalorder %s2792_s20, %s4095_s10 }
 0x171   : > { %p2795_p9 = pnand %p2793_p7, %p3341_p8 }
 0x173   : > { %p2796_p4 = pneg %p2795_p9 }
 0x175   : > { %p2801_p3 = pnand %p2799_p1, %p2796_p4 }
 0x177   : > { %2804 = shalt.err (!%p2801_p3)
}
 0x178   : > { %s2805_s7 = scalar_lea.vmem %s630_s24, 256  ;;  %p2813_p13 = scmp.lt.s32.totalorder %s630_s24, %s630_s24 }
 0x179   : > { %p2806_p10 = scmp.ne.s32.totalorder %s630_s24, %s2805_s7  ;;  %p2814_p0 = scmp.lt.s32.totalorder %s2805_s7, %s2805_s7 }
 0x17b   : > { %p2808_p11 = pnand %p2806_p10, %p3341_p8  ;;  %p2815_p2 = por %p2814_p0, %p2813_p13 }
 0x17d   : > { %p2809_p12 = pneg %p2808_p11 }
 0x17f   : > { %p2816_p5 = pnand %p2815_p2, %p2809_p12 }
 0x181   : > { %2819 = shalt.err (!%p2816_p5)
}
 0x182   : > { %2277 = dma.hbm_to_vmem [thread:$0]  (!%p3325_p6), %s4095_s10, 256, %s630_s24, [#allocation19], %s3158_s5, %s3158_s5, %s3159_s3  }
 0x183   : > { %s2820_s20 = scalar_lea.hbm %s4029_s12, 16 }
 0x184   : > { %p2821_p7 = scmp.ne.s32.totalorder %s4029_s12, %s2820_s20  ;;  %p2827_p1 = scmp.lt.u32.totalorder %s2820_s20, %s4029_s12 }
 0x186   : > { %p2823_p9 = pnand %p2821_p7, %p3341_p8 }
 0x188   : > { %p2824_p4 = pneg %p2823_p9 }
 0x18a   : > { %p2829_p3 = pnand %p2827_p1, %p2824_p4 }
 0x18c   : > { %2832 = shalt.err (!%p2829_p3)
}
 0x18d   : > { %s2833_s24 = scalar_lea.vmem %s3583_s22, 16  ;;  %s2840_s7 = scalar_lea.vmem %s3583_s22, 32 }
 0x18e   : > { %p2834_p10 = scmp.ne.s32.totalorder %s3583_s22, %s2833_s24  ;;  %p2841_p13 = scmp.lt.s32.totalorder %s3583_s22, %s3583_s22 }
 0x18f   : > { %p2842_p0 = scmp.lt.s32.totalorder %s2840_s7, %s2833_s24 }
 0x190   : > { %p2836_p11 = pnand %p2834_p10, %p3341_p8 }
 0x191   : > { %p2843_p2 = por %p2842_p0, %p2841_p13 }
 0x192   : > { %p2837_p12 = pneg %p2836_p11 }
 0x194   : > { %p2844_p5 = pnand %p2843_p2, %p2837_p12 }
 0x196   : > { %2847 = shalt.err (!%p2844_p5)
}
 0x197   : > { %2283 = dma.hbm_to_vmem [thread:$0]  (!%p3325_p6), %s4029_s12, 16, %s3583_s22, [#allocation22]  }
 0x198   : > { %s3164_s28 = smov [#allocation26]   ;;  %s3165_s20 = smov [#allocation29]  }
 0x199   : > { %s675_s23 = sshll.u32 %s3164_s28, 4  ;;  %s699_s2 = sshll.u32 %s3165_s20, 4  ;;  %s676_s23 = int_to_ptr.vmem [resolvable:$true] %s675_s23  ;;  %s3630_s2 = int_to_ptr.vmem [resolvable:$true] %s699_s2 }
 0x19a   : > { %s2848_s19 = scalar_lea.hbm %s4031_s14, 256 }
 0x19b   : > { %p2849_p7 = scmp.ne.s32.totalorder %s4031_s14, %s2848_s19  ;;  %p2855_p1 = scmp.lt.u32.totalorder %s2848_s19, %s4031_s14 }
 0x19d   : > { %p2851_p9 = pnand %p2849_p7, %p3341_p8 }
 0x19f   : > { %p2852_p4 = pneg %p2851_p9 }
 0x1a1   : > { %p2857_p3 = pnand %p2855_p1, %p2852_p4 }
 0x1a3   : > { %2860 = shalt.err (!%p2857_p3)
}
 0x1a4   : > { %s2861_s26 = scalar_lea.vmem %s676_s23, 256  ;;  %p2869_p13 = scmp.lt.s32.totalorder %s676_s23, %s676_s23 }
 0x1a5   : > { %p2862_p10 = scmp.ne.s32.totalorder %s676_s23, %s2861_s26  ;;  %p2870_p0 = scmp.lt.s32.totalorder %s2861_s26, %s2861_s26 }
 0x1a7   : > { %p2864_p11 = pnand %p2862_p10, %p3341_p8  ;;  %p2871_p2 = por %p2870_p0, %p2869_p13 }
 0x1a9   : > { %p2865_p12 = pneg %p2864_p11 }
 0x1ab   : > { %p2872_p5 = pnand %p2871_p2, %p2865_p12 }
 0x1ad   : > { %2875 = shalt.err (!%p2872_p5)
}
 0x1ae   : > { %2289 = dma.hbm_to_vmem [thread:$0]  (!%p3325_p6), %s4031_s14, 256, %s676_s23, [#allocation25], %s3158_s5, %s3158_s5, %s3159_s3  }
 0x1af   : > { %s2876_s19 = scalar_lea.hbm %s4033_s16, 512 }
 0x1b0   : > { %p2877_p7 = scmp.ne.s32.totalorder %s4033_s16, %s2876_s19  ;;  %p2883_p1 = scmp.lt.u32.totalorder %s2876_s19, %s4033_s16 }
 0x1b2   : > { %p2879_p9 = pnand %p2877_p7, %p3341_p8 }
 0x1b4   : > { %p2880_p4 = pneg %p2879_p9 }
 0x1b6   : > { %p2885_p3 = pnand %p2883_p1, %p2880_p4 }
 0x1b8   : > { %2888 = shalt.err (!%p2885_p3)
}
 0x1b9   : > { %s2889_s23 = scalar_lea.vmem %s3630_s2, 512  ;;  %p2897_p13 = scmp.lt.s32.totalorder %s3630_s2, %s3630_s2 }
 0x1ba   : > { %p2890_p10 = scmp.ne.s32.totalorder %s3630_s2, %s2889_s23  ;;  %p2898_p0 = scmp.lt.s32.totalorder %s2889_s23, %s2889_s23 }
 0x1bc   : > { %p2892_p11 = pnand %p2890_p10, %p3341_p8  ;;  %p2899_p2 = por %p2898_p0, %p2897_p13 }
 0x1be   : > { %p2893_p12 = pneg %p2892_p11 }
 0x1c0   : > { %p2900_p5 = pnand %p2899_p2, %p2893_p12 }
 0x1c2   : > { %2903 = shalt.err (!%p2900_p5)
}
 0x1c3   : > { %2295 = dma.hbm_to_vmem [thread:$0]  (!%p3325_p6), %s4033_s16, 512, %s3630_s2, [#allocation28], %s3158_s5, %s3158_s5, %s3159_s3  }
 0x1c4   : > { %s3166_s20 = smov [#allocation32]   ;;  %s3167_s29 = smov [#allocation33]  }
 0x1c5   : > { %s724_s1 = sshll.u32 %s3166_s20, 4  ;;  %s735_s19 = sshll.u32 %s3167_s29, 4  ;;  %s725_s1 = int_to_ptr.vmem [resolvable:$true] %s724_s1  ;;  %s3679_s19 = int_to_ptr.vmem [resolvable:$true] %s735_s19 }
 0x1c6   : > { %s2904_s21 = scalar_lea.hbm %s4035_s18, 16 }
 0x1c7   : > { %p2905_p7 = scmp.ne.s32.totalorder %s4035_s18, %s2904_s21  ;;  %p2911_p1 = scmp.lt.u32.totalorder %s2904_s21, %s4035_s18 }
 0x1c9   : > { %p2907_p9 = pnand %p2905_p7, %p3341_p8 }
 0x1cb   : > { %p2908_p4 = pneg %p2907_p9 }
 0x1cd   : > { %p2913_p3 = pnand %p2911_p1, %p2908_p4 }
 0x1cf   : > { %2916 = shalt.err (!%p2913_p3)
}
 0x1d0   : > { %s2917_s3 = scalar_lea.vmem %s725_s1, 16  ;;  %s2924_s2 = scalar_lea.vmem %s725_s1, 32 }
 0x1d1   : > { %p2918_p10 = scmp.ne.s32.totalorder %s725_s1, %s2917_s3  ;;  %p2925_p13 = scmp.lt.s32.totalorder %s725_s1, %s725_s1 }
 0x1d2   : > { %p2926_p0 = scmp.lt.s32.totalorder %s2924_s2, %s2917_s3 }
 0x1d3   : > { %p2920_p11 = pnand %p2918_p10, %p3341_p8 }
 0x1d4   : > { %p2927_p2 = por %p2926_p0, %p2925_p13 }
 0x1d5   : > { %p2921_p12 = pneg %p2920_p11 }
 0x1d7   : > { %p2928_p5 = pnand %p2927_p2, %p2921_p12 }
 0x1d9   : > { %2931 = shalt.err (!%p2928_p5)
}
 0x1da   : > { %2301 = dma.hbm_to_vmem [thread:$0]  (!%p3325_p6), %s4035_s18, 16, %s725_s1, [#allocation31]  }
 0x1db   : > { %s4096_s7 = sld [smem:[#allocation68_spill]] }
 0x1e1   : > { %s2932_s21 = scalar_lea.hbm %s4096_s7, 16 }
 0x1e2   : > { %p2933_p7 = scmp.ne.s32.totalorder %s4096_s7, %s2932_s21  ;;  %p2939_p1 = scmp.lt.u32.totalorder %s2932_s21, %s4096_s7 }
 0x1e4   : > { %p2935_p9 = pnand %p2933_p7, %p3341_p8 }
 0x1e6   : > { %p2936_p4 = pneg %p2935_p9 }
 0x1e8   : > { %p2941_p3 = pnand %p2939_p1, %p2936_p4 }
 0x1ea   : > { %2944 = shalt.err (!%p2941_p3)
}
 0x1eb   : > { %s2945_s1 = scalar_lea.vmem %s3679_s19, 16  ;;  %s2952_s3 = scalar_lea.vmem %s3679_s19, 32 }
 0x1ec   : > { %p2946_p10 = scmp.ne.s32.totalorder %s3679_s19, %s2945_s1  ;;  %p2953_p13 = scmp.lt.s32.totalorder %s3679_s19, %s3679_s19 }
 0x1ed   : > { %p2954_p0 = scmp.lt.s32.totalorder %s2952_s3, %s2945_s1 }
 0x1ee   : > { %p2948_p11 = pnand %p2946_p10, %p3341_p8 }
 0x1ef   : > { %p2955_p2 = por %p2954_p0, %p2953_p13 }
 0x1f0   : > { %p2949_p12 = pneg %p2948_p11 }
 0x1f2   : > { %p2956_p5 = pnand %p2955_p2, %p2949_p12 }
 0x1f4   : > { %2959 = shalt.err (!%p2956_p5)
}
 0x1f5   : > { %s4097_s20 = sld [smem:[#allocation53_spill]]  ;;  %s4098_s29 = sld [smem:[#allocation51_spill]] }
 0x1f6   : > { %s4099_s24 = sld [smem:[#allocation50_spill]]  ;;  %s4100_s4 = sld [smem:[#allocation49_spill]] }
 0x1f7   : > { %s4101_s21 = sld [smem:[#allocation54_spill]]  ;;  %s1981_s22 = sadd.s32 4294967294, %s3146_s25  }
 0x1f8   : > { %2304 = dma.hbm_to_vmem [thread:$0]  (!%p3325_p6), %s4096_s7, 16, %s3679_s19, [#allocation34]  }
 0x1f9   : > { %p75_p9 = scmp.eq.s32.totalorder %s3146_s25, 0  ;;  %p516_p13 = scmp.eq.s32.totalorder %s1981_s22, 1 }
 0x1fa   : > { %p2334_p2 = scmp.lt.s32.totalorder %s3146_s25, 2  ;;  %s4107_s0 = sld [smem:[#allocation56_spill]] }
 0x1fb   : > { %s60_s23 = sadd.s32 1, %s4097_s20  ;;  %s67_s30 = sadd.s32 1, %s4098_s29 }
 0x1fc   : > { %p62_p8 = scmp.ge.s32.totalorder %s60_s23, 2  ;;  %p74_p7 = scmp.ne.s32.totalorder %s4098_s29, %s4099_s24 }
 0x1fd   : > { %p80_p1 = scmp.ne.s32.totalorder %s4099_s24, %s4100_s4  ;;  %p510_p6 = scmp.eq.s32.totalorder %s4101_s21, 1 }
 0x1fe   : > { %s4150_s23 = smov (%p62_p8, %s60_s23), 0  ;;  %p3731_p4 = por %p75_p9, %p74_p7 }
 0x1ff   : > { %s64_s19 = ssub.s32 %s4097_s20, %s4150_s23  ;;  %p4103_p10 = scmp.eq.s32.totalorder %s4101_s21, 0 }
 0x200   : > { %p65_p3 = scmp.eq.s32.totalorder %s64_s19, 0  ;;  %p3746_p12 = por %p510_p6, %p74_p7 }
 0x201   : > { %p3742_p11 = por %p4103_p10, %p80_p1  ;;  %p3753_p0 = por %p516_p13, %p80_p1 }
 0x202   : > { %s4105_s1 = scalar_select %p3746_p12, 1, 0 }
 0x203   : > { %s4104_s5 = scalar_select %p3742_p11, 1, 0 }
 0x204   : > { %s3751_s3 = scalar_select %p65_p3, %s4098_s29, %s67_s30  }
 0x205   : > { %s4106_s2 = scalar_select %p3753_p0, 1, 0 }
 0x206   : > { %s3759_s28 = sand.u32 1, %s4098_s29   ;;  %s2003_s24 = sshll.u32 %s4097_s20, 7 }
 0x207   : > { %s2002_s4 = sshll.u32 %s3759_s28, 3  ;;  %s3766_s6 = scalar_lea.hbm %s4107_s0, %s2003_s24 }
 0x208   : > { %s750_s22 = scalar_lea.vmem [#allocation3], %s2002_s4  ;;  %p3770_p5 = pnand %p2334_p2, %p3731_p4 }
 0x209   : > { %s757_s30 = sshll.u32 %s750_s22, 4  ;;  %s747_s8 = scalar_lea.sflag [#allocation4], %s3759_s28  ;;  %s3774_s30 = int_to_ptr.vmem [resolvable:$true] %s757_s30 }
 0x20a   : > { %s2960_s21 = scalar_lea.hbm %s3766_s6, 128  ;;  %p2962_p7 = pneg %p3770_p5 }
 0x20b   : > { %p2961_p8 = scmp.ne.s32.totalorder %s3766_s6, %s2960_s21  ;;  %s2965_s4 = scalar_lea.hbm %s4107_s0, 256 }
 0x20c   : > { %p2966_p4 = scmp.lt.u32.totalorder %s3766_s6, %s4107_s0  ;;  %p2967_p6 = scmp.lt.u32.totalorder %s2965_s4, %s2960_s21 }
 0x20d   : > { %p2963_p9 = pnand %p2962_p7, %p2961_p8  ;;  %p2969_p10 = scmp.lt.u32.totalorder %s2960_s21, %s3766_s6 }
 0x20e   : > { %p2968_p3 = por %p2967_p6, %p2966_p4 }
 0x20f   : > { %p2964_p1 = pneg %p2963_p9 }
 0x210   : > { %p2970_p13 = por %p2969_p10, %p2968_p3 }
 0x212   : > { %p2971_p2 = pnand %p2970_p13, %p2964_p1 }
 0x214   : > { %2974 = shalt.err (!%p2971_p2)
}
 0x215   : > { %s2975_s29 = scalar_lea.vmem %s3774_s30, 128  ;;  %s3168_s24 = smov [#allocation3]  }
 0x216   : > { %p2976_p8 = scmp.ne.s32.totalorder %s3774_s30, %s2975_s29  ;;  %s2980_s26 = sshll.u32 %s3168_s24, 4  ;;  %s2981_s26 = int_to_ptr.vmem [resolvable:$false] %s2980_s26 }
 0x217   : > { %s2982_s19 = scalar_lea.vmem %s2981_s26, 256  ;;  %p2983_p12 = scmp.lt.s32.totalorder %s3774_s30, %s2981_s26 }
 0x218   : > { %p2978_p9 = pnand %p2976_p8, %p2962_p7  ;;  %p2984_p4 = scmp.lt.s32.totalorder %s2982_s19, %s2975_s29 }
 0x21a   : > { %p2979_p0 = pneg %p2978_p9  ;;  %p2985_p6 = por %p2984_p4, %p2983_p12 }
 0x21c   : > { %p2986_p3 = pnand %p2985_p6, %p2979_p0 }
 0x21e   : > { %2989 = shalt.err (!%p2986_p3)
}
 0x21f   : > { %2308 = dma.hbm_to_vmem [thread:$0]  (!%p3770_p5), %s3766_s6, 128, %s3774_s30, %s747_s8  }
 0x220   : > { %s2004_s21 = sshll.u32 %s4097_s20, 4  ;;  %s4109_s24 = sld [smem:[#allocation57_spill]] }
 0x221   : > { %s767_s29 = scalar_lea.vmem [#allocation6], %s3759_s28  ;;  %s4111_s19 = sand.u32 1, %s3146_s25  }
 0x222   : > { %s774_s26 = sshll.u32 %s767_s29, 4  ;;  %s765_s10 = scalar_lea.sflag [#allocation7], %s4111_s19  ;;  %s775_s26 = int_to_ptr.vmem [resolvable:$true] %s774_s26 }
 0x226   : > { %s4110_s0 = smov %s4109_s24  ;;  %s3807_s9 = scalar_lea.hbm %s4109_s24, %s2004_s21 }
 0x227   : > { %s2990_s11 = scalar_lea.hbm %s3807_s9, 16  ;;  %s2995_s20 = scalar_lea.hbm %s4110_s0, 32 }
 0x228   : > { %p2991_p12 = scmp.ne.s32.totalorder %s3807_s9, %s2990_s11  ;;  %p2996_p10 = scmp.lt.u32.totalorder %s3807_s9, %s4110_s0 }
 0x229   : > { %p2997_p13 = scmp.lt.u32.totalorder %s2995_s20, %s2990_s11  ;;  %p2999_p8 = scmp.lt.u32.totalorder %s2990_s11, %s3807_s9 }
 0x22a   : > { %p2993_p0 = pnand %p2991_p12, %p2962_p7 }
 0x22b   : > { %p2998_p2 = por %p2997_p13, %p2996_p10 }
 0x22c   : > { %p2994_p1 = pneg %p2993_p0 }
 0x22d   : > { %p3000_p9 = por %p2999_p8, %p2998_p2 }
 0x22f   : > { %p3001_p4 = pnand %p3000_p9, %p2994_p1 }
 0x231   : > { %3004 = shalt.err (!%p3001_p4)
}
 0x232   : > { %s3005_s28 = scalar_lea.vmem %s775_s26, 16  ;;  %s3169_s4 = smov [#allocation6]  }
 0x233   : > { %p3006_p6 = scmp.ne.s32.totalorder %s775_s26, %s3005_s28  ;;  %s3010_s22 = sshll.u32 %s3169_s4, 4  ;;  %s3011_s22 = int_to_ptr.vmem [resolvable:$false] %s3010_s22 }
 0x234   : > { %s3012_s24 = scalar_lea.vmem %s3011_s22, 32  ;;  %p3013_p0 = scmp.lt.s32.totalorder %s775_s26, %s3011_s22 }
 0x235   : > { %p3008_p3 = pnand %p3006_p6, %p2962_p7  ;;  %p3014_p11 = scmp.lt.s32.totalorder %s3012_s24, %s3005_s28 }
 0x237   : > { %p3009_p12 = pneg %p3008_p3  ;;  %p3015_p10 = por %p3014_p11, %p3013_p0 }
 0x239   : > { %p3016_p13 = pnand %p3015_p10, %p3009_p12 }
 0x23b   : > { %3019 = shalt.err (!%p3016_p13)
}
 0x23c   : > { %2311 = dma.hbm_to_vmem [thread:$0]  (!%p3770_p5), %s3807_s9, 16, %s775_s26, %s765_s10  }
 0x23d   : > { %s4112_s11 = sld [smem:[#allocation55_spill]] }
 0x243   : > { %p4113_p1 = scmp.ne.s32.totalorder %s4112_s11, 0 }
 0x244   : > { %s4114_s29 = sld [smem:[#allocation50_spill]] (!%p4113_p1)  ;;  %p4115_p11 = scmp.ne.s32.totalorder (!%p4113_p1), %s4104_s5, 0 }
 0x245   : > { %783 = sbr.rel (%p4113_p1) target bundleno = 3038 (0xbde), region = 100 }
 0x24a   : > { %s3834_s19 = sand.u32 (!%p4113_p1), 1, %s4114_s29  }
 0x24b   : > { %s2006_s6 = sshll.u32 (!%p4113_p1), %s3834_s19, 3  ;;  %s786_s8 = scalar_lea.sflag (!%p4113_p1), [#allocation4], %s3834_s19 }
 0x24c   : > { %s789_s20 = scalar_lea.vmem [#allocation3], %s2006_s6 }
 0x24d   : > { %3073 = dma.done.wait (%p4115_p11), %s786_s8, 128  }
 0x24e   : > { %3075 = vsyncadd (%p4115_p11), %s786_s8, 4294967168  ;;  %s4116_s9 = sld [smem:[#allocation54_spill]]  ;;  %s797_s26 = scalar_lea.vmem [#allocation6], %s3834_s19 }
 0x254   : > { %s794_s10 = sand.u32 1, %s4116_s9  }
 0x255   : > { %s795_s7 = scalar_lea.sflag [#allocation7], %s794_s10 }
 0x256   : > { %3077 = dma.done.wait (%p4115_p11), %s795_s7, 16  }
 0x257   : > { %3079 = vsyncadd (%p4115_p11), %s795_s7, 4294967280  ;;  %p4117_p5 = scmp.eq.s32.totalorder %s4116_s9, 0 }
 0x259   : > { %3081 = dma.done.wait (%p4117_p5), [#allocation7], 16   ;;  %p4118_p7 = pmov %p4117_p5 }
 0x25a   : > { %p4119_p2 = pmov %p4117_p5 }
 0x25b   : > { %3083 = vsyncadd (%p4118_p7), [#allocation7], 4294967280 }
 0x25c   : > { %3085 = dma.done.wait (%p4119_p2), [#allocation10], 272   ;;  %p4120_p8 = pmov %p4119_p2 }
 0x25d   : > { %p4121_p9 = pmov %p4119_p2 }
 0x25e   : > { %3087 = vsyncadd (%p4120_p8), [#allocation10], 4294967024 }
 0x25f   : > { %3089 = dma.done.wait (%p4121_p9), [#allocation13], 272   ;;  %p4122_p4 = pmov %p4119_p2 }
 0x260   : > { %p4123_p6 = pmov %p4119_p2 }
 0x261   : > { %3091 = vsyncadd (%p4122_p4), [#allocation13], 4294967024 }
 0x262   : > { %3093 = dma.done.wait (%p4123_p6), [#allocation16], 272   ;;  %p4124_p3 = pmov %p4119_p2 }
 0x263   : > { %p4125_p12 = pmov %p4119_p2 }
 0x264   : > { %3095 = vsyncadd (%p4124_p3), [#allocation16], 4294967024 }
 0x265   : > { %3097 = dma.done.wait (%p4125_p12), [#allocation19], 272   ;;  %p4126_p0 = pmov %p4119_p2 }
 0x267   : > { %3099 = vsyncadd (%p4126_p0), [#allocation19], 4294967024  ;;  %p4127_p10 = pmov %p4126_p0 }
 0x268   : > { %p4128_p13 = pmov %p4126_p0 }
 0x269   : > { %3101 = dma.done.wait (%p4127_p10), [#allocation22], 32  }
 0x26a   : > { %3103 = vsyncadd (%p4128_p13), [#allocation22], 4294967264  ;;  %p4129_p1 = pmov %p4126_p0 }
 0x26b   : > { %p4130_p11 = pmov %p4126_p0 }
 0x26c   : > { %3105 = dma.done.wait (%p4129_p1), [#allocation25], 272  }
 0x26d   : > { %3107 = vsyncadd (%p4130_p11), [#allocation25], 4294967024  ;;  %p4131_p5 = pmov %p4126_p0 }
 0x26e   : > { %p4132_p7 = pmov %p4126_p0 }
 0x26f   : > { %3109 = dma.done.wait (%p4131_p5), [#allocation28], 528  }
 0x270   : > { %3111 = vsyncadd (%p4132_p7), [#allocation28], 4294966768  ;;  %p4133_p2 = pmov %p4126_p0 }
 0x271   : > { %p4134_p8 = pmov %p4126_p0 }
 0x272   : > { %3113 = dma.done.wait (%p4133_p2), [#allocation31], 32  }
 0x273   : > { %3115 = vsyncadd (%p4134_p8), [#allocation31], 4294967264  ;;  %p4135_p9 = pmov %p4126_p0 }
 0x274   : > { %p4136_p4 = pmov %p4126_p0 }
 0x275   : > { %3117 = dma.done.wait (%p4135_p9), [#allocation34], 16  }
 0x276   : > { %3119 = vsyncadd (%p4136_p4), [#allocation34], 4294967280  ;;  %vm934_vm0 = vcmask 261120   ;;  %v931_v0 = vld [vmem:[%s789_s20] sm:$0xff]  ;;  %v2426_v4 = vld [vmem:[#allocation11] sm:$0xff]   ;;  %v3170_v6 = vmov 0.0   ;;  %v1166_v53 = vlaneseq }
 0x277   : > { %v935_v1 = vsel %vm934_vm0, %v931_v0, 0.0  ;;  %v940_v2 = vmul.f32 %v931_v0, %v931_v0  ;;  %v2427_v5 = vld [vmem:[#allocation14] sm:$0xff]   ;;  %2096 = vmatprep.subr.bf16.mxu0 %v3170_v6  ;;  %2104 = vmatprep.subr.bf16.mxu1 %v3170_v6  ;;  %v2428_v7 = vld [vmem:[#allocation11 + $0x8] sm:$0xff]   ;;  %v2429_v8 = vld [vmem:[#allocation14 + $0x8] sm:$0xff]   ;;  %vm3171_vm1 = vmmov 0   ;;  %vm1171_vm2 = vcmask 130048  }
 0x278   : > { %936 = vadd.xlane.f32.xlu0 %v935_v1  ;;  %2097 = vmatpush3.bf16.msra.mxu0 %v2426_v4  ;;  %v2026_v18 = vld [vmem:[#allocation8] ss:$0 sm:$0xff]  ;;  %v2027_v20 = vld [vmem:[#allocation9] ss:$0 sm:$0xff]  ;;  %v2430_v23 = vld [vmem:[#allocation17] sm:$0xff]   ;;  %s3172_s5 = smov 112  }
 0x279   : > { %v941_v3 = vsel %vm934_vm0, %v940_v2, 0.0  ;;  %2105 = vmatpush3.bf16.msra.mxu1 %v2427_v5  ;;  %2098 = vmatprep.subr.bf16.mxu0 %v3170_v6  ;;  %v2431_v25 = vld [vmem:[#allocation17 + $0x8] sm:$0xff]   ;;  %v2032_v27 = vld [vmem:[#allocation15] ss:$0 sm:$0xff]  ;;  %v2036_v41 = vld [vmem:[#allocation18] ss:$0 sm:$0xff] }
 0x27a   : > { %2106 = vmatprep.subr.bf16.mxu1 %v3170_v6  ;;  %2100 = vmatprep.mubr.msk.bf16.mxu0 %vm3171_vm1, %v3170_v6  ;;  %v2028_v26 = vld [vmem:[#allocation12] ss:$0 sm:$0xff]  ;;  %vm1234_vm3 = vcmask 1043456   ;;  %v965_v54 = vld [vmem:[%s797_s26] sm:$0x1]  ;;  %v1167_v56 = vshrl.u32 %v1166_v53, 7 }
 0x27b   : > { %2108 = vmatprep.mubr.msk.bf16.mxu1 %vm3171_vm1, %v3170_v6  ;;  %v966_v55 = vsub.f32 1.0, %v965_v54  ;;  %vm1218_vm4 = vcmask 64512   ;;  %vm1279_vm5 = vcmask 125952   ;;  %s3173_s30 = smov 16   ;;  %vm1401_vm6 = vcmask 257152   ;;  %v2434_v54 = vld [vmem:[#allocation26] sm:$0xff]  }
 0x27c   : > { %942 = vadd.xlane.f32.xlu0 %v941_v3  ;;  %2099 = vmatpush3.bf16.msra.mxu0 %v2428_v7  ;;  %v1168_v58 = vsub.s32 0, %v1167_v56  ;;  %vm1618_vm7 = vcmask 523264   ;;  %s4137_s21 = sld [smem:[#allocation52_spill]]  ;;  %s929_s4 = scalar_lea.vmem [#allocation35], %s2006_s6 }
 0x27d   : > { %2107 = vmatpush3.bf16.msra.mxu1 %v2429_v8  ;;  %2112 = vmatprep.subr.bf16.mxu0 %v3170_v6  ;;  %v967_v57 = vmul.f32 -1e+09, %v966_v55  ;;  %v2435_v55 = vld [vmem:[#allocation26 + $0x8] sm:$0xff]   ;;  %s1710_s22 = sshll.u32 %s929_s4, 4  ;;  %s4138_s29 = sld [smem:[#allocation69_spill]]  ;;  %s3969_s22 = int_to_ptr.vmem [resolvable:$true] %s1710_s22 }
 0x27e   : > { %2120 = vmatprep.subr.bf16.mxu1 %v3170_v6  ;;  %s1696_s20 = scalar_lea.sflag [#allocation5], %s3834_s19  ;;  %s3020_s9 = scalar_lea.vmem %s3969_s22, 128 }
 0x27f   : > { %v1169_v59 = vrot.slane %v967_v57, %v1168_v58  ;;  %p3021_p6 = scmp.ne.s32.totalorder %s3969_s22, %s3020_s9  ;;  %p4139_p3 = scmp.ne.s32.totalorder %s4105_s1, 0 }
 0x280   : > { %s3174_s6 = smov [#allocation35]  }
 0x281   : > { %p3022_p12 = pnand %p3021_p6, %p4139_p3  ;;  %s3024_s10 = sshll.u32 %s3174_s6, 4  ;;  %s3025_s10 = int_to_ptr.vmem [resolvable:$false] %s3024_s10 }
 0x282   : > { %s2064_s28 = sshll.u32 %s4137_s21, 7  ;;  %s3026_s7 = scalar_lea.vmem %s3025_s10, 256 }
 0x283   : > { %s3967_s8 = scalar_lea.hbm %s4138_s29, %s2064_s28  ;;  %p3023_p0 = pneg %p3022_p12 }
 0x284   : > { %p3027_p10 = scmp.lt.s32.totalorder %s3969_s22, %s3025_s10  ;;  %p3028_p13 = scmp.lt.s32.totalorder %s3026_s7, %s3020_s9 }
 0x286   : > { %p3029_p1 = por %p3028_p13, %p3027_p10 }
 0x288   : > { %p3030_p11 = pnand %p3029_p1, %p3023_p0 }
 0x305   : > { %v937_v9 = vpop.xlane.xlu0 %936 }
 0x306   : > { %v939_v10 = vmul.f32 0.03125, %v937_v9 }
 0x308   : > { %v945_v12 = vmul.f32 %v939_v10, %v939_v10  ;;  %v947_v16 = vsub.f32 %v931_v0, %v939_v10 }
 0x309   : > { %v943_v11 = vpop.xlane.xlu0 %942 }
 0x30a   : > { %v944_v13 = vmul.f32 0.03125, %v943_v11 }
 0x30c   : > { %v946_v14 = vsub.f32 %v944_v13, %v945_v12 }
 0x30e   : > { %v948_v15 = vadd.f32 1e-12, %v946_v14 }
 0x310   : > { %2440 = vrsqrt.f32 %v948_v15 }
 0x31a   : > { %v2441_v17 = vpop.eup %2440 }
 0x31b   : > { %v950_v19 = vmul.f32 %v2441_v17, %v947_v16 }
 0x31d   : > { %v957_v21 = vmul.f32 %v2026_v18, %v950_v19 }
 0x31f   : > { %v3902_v22 = vadd.f32 %v2027_v20, %v957_v21 }
 0x321   : > { %v968_v24 = vpack.c.bf16 %v3902_v22, %v3902_v22 }
 0x323   : > { %2101 = vmatmul.mubr.msk.bf16.vlgmr.msra.gmra.mrb[0].mxu0 %vm934_vm0, %v968_v24  ;;  %2109 = vmatmul.mubr.msk.bf16.vlgmr.msra.gmra.mrb[0].mxu1 %vm934_vm0, %v968_v24 }
 0x324   : > { %2113 = vmatpush3.bf16.msra.mxu0 %v2430_v23  ;;  %2116 = vmatprep.mubr.msk.bf16.mxu0 %vm3171_vm1, %v3170_v6 }
 0x325   : > { %2114 = vmatprep.subr.bf16.mxu0 %v3170_v6  ;;  %2122 = vmatprep.mubr.msk.bf16.mxu1 %vm3171_vm1, %v3170_v6 }
 0x328   : > { %2115 = vmatpush3.bf16.msra.mxu0 %v2431_v25 }
 0x329   : > { %2126 = vmatprep.subr.bf16.mxu0 %v3170_v6 }
 0x32b   : > { %2117 = vmatmul.mubr.msk.bf16.vlgmr.msra.gmra.mrb[4].mxu0 %vm934_vm0, %v968_v24 }
 0x32c   : > { %2128 = vmatprep.mubr.msk.bf16.mxu0 %vm3171_vm1, %v3170_v6 }
 0x3f6   : > { %v1029_v28 = vpop.f32.mrb[0].mxu0  ;;  %v1092_v29 = vpop.f32.mrb[0].mxu1 }
 0x3f7   : > { %v1030_v30 = vadd.f32 %v2028_v26, %v1029_v28  ;;  %v1093_v31 = vadd.f32 %v2032_v27, %v1092_v29  ;;  %v2102_v32 = vpop.f32.mrb[1].mxu0  ;;  %v2110_v33 = vpop.f32.mrb[1].mxu1 }
 0x3f8   : > { %v1032_v34 = vpop.f32.mrb[2].mxu0  ;;  %v1095_v35 = vpop.f32.mrb[2].mxu1 }
 0x3f9   : > { %v1161_v36 = vmul.f32 0.25, %v1030_v30  ;;  %v1163_v37 = vpack.c.bf16 %v1093_v31, %v1093_v31  ;;  %v2103_v38 = vpop.f32.mrb[3].mxu0  ;;  %v2111_v39 = vpop.f32.mrb[3].mxu1  ;;  %v2432_v35 = vld [vmem:[#allocation20] sm:$0xff]  }
 0x3fb   : > { %v1176_v40 = vsel %vm1171_vm2, %v1163_v37, 0  ;;  %1285 = vrot.lane.b32.xlu1 %v1163_v37, %s3172_s5  ;;  %v1162_v42 = vpack.c.bf16 %v1161_v36, %v1161_v36  ;;  %v2433_v36 = vld [vmem:[#allocation20 + $0x8] sm:$0xff]  }
 0x3fc   : > { %2121 = vmatpush3.bf16.xpose.msra.mxu1 %v1176_v40 }
 0x3fd   : > { %2132 = vmatprep.subr.bf16.mxu1 %v3170_v6 }
 0x3fe   : > { %v1155_v43 = vpop.f32.mrb[4].mxu0 }
 0x3ff   : > { %v1156_v44 = vadd.f32 %v2036_v41, %v1155_v43  ;;  %1282 = vrot.lane.b32.xlu1 %v1162_v42, %s3172_s5  ;;  %v2118_v45 = vpop.f32.mrb[5].mxu0 }
 0x400   : > { %v1158_v46 = vpop.f32.mrb[6].mxu0 }
 0x401   : > { %v1164_v47 = vpack.c.bf16 %v1156_v44, %v1156_v44  ;;  %v2119_v48 = vpop.f32.mrb[7].mxu0  ;;  %v2045_v44 = vld [vmem:[#allocation21] ss:$0 sm:$0xff] }
 0x403   : > { %v1236_v49 = vsel %vm1234_vm3, %v1164_v47, 0  ;;  %2123 = vmatmul.mubr.msk.bf16.vlgmr.msra.gmra.mrb[4].mxu1 %vm1171_vm2, %v1162_v42 }
 0x404   : > { %2127 = vmatpush3.bf16.msra.mxu0 %v1236_v49  ;;  %2134 = vmatprep.mubr.msk.bf16.mxu1 %vm3171_vm1, %v3170_v6 }
 0x405   : > { %2138 = vmatprep.subr.bf16.mxu0 %v3170_v6 }
 0x46d   : > { %v1286_v50 = vpop.permute.xlu1 %1285 }
 0x46e   : > { %v1291_v51 = vsel %vm1171_vm2, %v1286_v50, 0 }
 0x46f   : > { %2133 = vmatpush3.bf16.xpose.msra.mxu1 %v1291_v51 }
 0x470   : > { %2144 = vmatprep.subr.bf16.mxu1 %v3170_v6 }
 0x471   : > { %v1283_v52 = vpop.permute.xlu1 %1282 }
 0x476   : > { %2135 = vmatmul.mubr.msk.bf16.vlgmr.msra.gmra.mrb[8].mxu1 %vm1171_vm2, %v1283_v52 }
 0x477   : > { %2148 = vmatprep.mubr.msk.bf16.mxu1 %vm3171_vm1, %v3170_v6  ;;  %2145 = vmatpush3.bf16.msra.mxu1 %v2432_v35 }
 0x478   : > { %2146 = vmatprep.subr.bf16.mxu1 %v3170_v6 }
 0x47b   : > { %2147 = vmatpush3.bf16.msra.mxu1 %v2433_v36 }
 0x47c   : > { %2160 = vmatprep.subr.bf16.mxu1 %v3170_v6 }
 0x4d6   : > { %v1212_v60 = vpop.f32.mrb[4].mxu1 }
 0x4d7   : > { %v1213_v61 = vadd.f32 %v1212_v60, %v1169_v59  ;;  %v2124_v62 = vpop.f32.mrb[5].mxu1 }
 0x4d8   : > { %v1215_v63 = vpop.f32.mrb[6].mxu1 }
 0x4d9   : > { %v2125_v0 = vpop.f32.mrb[7].mxu1  ;;  %v1219_v1 = vsel %vm1218_vm4, %v1213_v61, -inf }
 0x4da   : > { %1220 = vmax.xlane.f32.xlu0 %v1219_v1  ;;  %v2049_v0 = vld [vmem:[#allocation23] ss:$0 sm:$0xff] }
 0x549   : > { %v1327_v2 = vpop.f32.mrb[8].mxu1 }
 0x54a   : > { %v1328_v3 = vadd.f32 %v1327_v2, %v1169_v59  ;;  %v2136_v4 = vpop.f32.mrb[9].mxu1  ;;  %v2050_v2 = vld [vmem:[#allocation24] ss:$0 sm:$0xff] }
 0x54b   : > { %v1330_v5 = vpop.f32.mrb[10].mxu1 }
 0x54c   : > { %v2137_v7 = vpop.f32.mrb[11].mxu1  ;;  %v1333_v8 = vsel %vm1218_vm4, %v1328_v3, -inf }
 0x54d   : > { %1334 = vmax.xlane.f32.xlu1 %v1333_v8  ;;  %v2436_v7 = vld [vmem:[#allocation29] sm:$0xff]   ;;  %v2437_v8 = vld [vmem:[#allocation29 + $0x8] sm:$0xff]  }
 0x567   : > { %v1221_v9 = vpop.xlane.xlu0 %1220 }
 0x568   : > { %v1222_v10 = vsub.f32 %v1213_v61, %v1221_v9  ;;  %v2438_v9 = vld [vmem:[#allocation29 + $0x10] sm:$0xff]  }
 0x56a   : > { %v1223_v11 = vmul.f32 1.442695, %v1222_v10  ;;  %v2439_v10 = vld [vmem:[#allocation29 + $0x18] sm:$0xff]  }
 0x56c   : > { %2442 = vpow2.f32 %v1223_v11  ;;  %v2051_v11 = vld [vmem:[#allocation27] ss:$0 sm:$0xff] }
 0x576   : > { %v2443_v12 = vpop.eup %2442 }
 0x577   : > { %v1225_v13 = vsel %vm1218_vm4, %v2443_v12, 0.0 }
 0x578   : > { %1226 = vadd.xlane.f32.xlu0 %v1225_v13 }
 0x5da   : > { %v1335_v14 = vpop.xlane.xlu1 %1334 }
 0x5db   : > { %v1336_v15 = vsub.f32 %v1328_v3, %v1335_v14 }
 0x5dd   : > { %v1337_v16 = vmul.f32 1.442695, %v1336_v15 }
 0x5df   : > { %2444 = vpow2.f32 %v1337_v16 }
 0x5e9   : > { %v2445_v17 = vpop.eup %2444 }
 0x5ea   : > { %v1339_v18 = vsel %vm1218_vm4, %v2445_v17, 0.0 }
 0x5eb   : > { %1340 = vadd.xlane.f32.xlu0 %v1339_v18 }
 0x601   : > { %1346 = vrot.lane.b32.xlu0 %v1164_v47, %s3172_s5 }
 0x605   : > { %v1227_v19 = vpop.xlane.xlu0 %1226 }
 0x606   : > { %2446 = vrcp.f32 %v1227_v19 }
 0x610   : > { %v2447_v20 = vpop.eup %2446 }
 0x611   : > { %v1229_v21 = vmul.f32 %v2447_v20, %v2443_v12 }
 0x613   : > { %v1230_v23 = vpack.c.bf16 %v1229_v21, %v1229_v21 }
 0x615   : > { %2129 = vmatmul.mubr.msk.bf16.vlgmr.msra.gmra.mrb[8].mxu0 %vm1218_vm4, %v1230_v23 }
 0x616   : > { %2140 = vmatprep.mubr.msk.bf16.mxu0 %vm3171_vm1, %v3170_v6 }
 0x678   : > { %v1341_v24 = vpop.xlane.xlu0 %1340 }
 0x679   : > { %2448 = vrcp.f32 %v1341_v24 }
 0x67c   : > { %v1347_v25 = vpop.permute.xlu0 %1346 }
 0x67d   : > { %v1352_v26 = vsel %vm1234_vm3, %v1347_v25, 0 }
 0x67e   : > { %2139 = vmatpush3.bf16.msra.mxu0 %v1352_v26 }
 0x67f   : > { %2152 = vmatprep.subr.bf16.mxu0 %v3170_v6 }
 0x683   : > { %v2449_v27 = vpop.eup %2448 }
 0x684   : > { %v1343_v28 = vmul.f32 %v2449_v27, %v2445_v17  ;;  %v2055_v27 = vld [vmem:[#allocation30] ss:$0 sm:$0xff] }
 0x686   : > { %v1344_v29 = vpack.c.bf16 %v1343_v28, %v1343_v28 }
 0x688   : > { %2141 = vmatmul.mubr.msk.bf16.vlgmr.msra.gmra.mrb[12].mxu0 %vm1218_vm4, %v1344_v29 }
 0x689   : > { %2156 = vmatprep.mubr.msk.bf16.mxu0 %vm3171_vm1, %v3170_v6  ;;  %2153 = vmatpush3.bf16.msra.mxu0 %v2434_v54 }
 0x68a   : > { %2154 = vmatprep.subr.bf16.mxu0 %v3170_v6 }
 0x68d   : > { %2155 = vmatpush3.bf16.msra.mxu0 %v2435_v55 }
 0x6e8   : > { %v1272_v30 = vpop.f32.mrb[8].mxu0 }
 0x6e9   : > { %v1278_v31 = vpack.c.bf16 %v1272_v30, %v1272_v30  ;;  %v2130_v32 = vpop.f32.mrb[9].mxu0 }
 0x6ea   : > { %v1275_v33 = vpop.f32.mrb[10].mxu0 }
 0x6eb   : > { %1280 = vst.msk [vmem:[#allocation2] sm:$0xf] %vm1279_vm5, %v1278_v31  ;;  %v2131_v34 = vpop.f32.mrb[11].mxu0 }
 0x75b   : > { %v1388_v37 = vpop.f32.mrb[12].mxu0 }
 0x75c   : > { %v2067_v38 = vpack.c.bf16 %v1388_v37, %v1388_v37  ;;  %v2142_v39 = vpop.f32.mrb[13].mxu0 }
 0x75d   : > { %v1391_v40 = vpop.f32.mrb[14].mxu0 }
 0x75e   : > { %1398 = vrot.lane.b32.xlu0 %v2067_v38, %s3173_s30  ;;  %v2143_v41 = vpop.f32.mrb[15].mxu0 }
 0x7d0   : > { %v1399_v42 = vpop.permute.xlu0 %1398 }
 0x7d1   : > { %1402 = vst.msk [vmem:[#allocation2] sm:$0xf] %vm1401_vm6, %v1399_v42 }
 0x7d8   : > { %v1403_v43 = vld [vmem:[#allocation2] sm:$0xf] }
 0x7d9   : > { %2149 = vmatmul.mubr.msk.bf16.vlgmr.msra.gmra.mrb[12].mxu1 %vm934_vm0, %v1403_v43 }
 0x7da   : > { %2168 = vmatprep.mubr.msk.bf16.mxu1 %vm3171_vm1, %v3170_v6  ;;  %2161 = vmatpush3.bf16.msra.mxu1 %v2436_v7 }
 0x7db   : > { %2162 = vmatprep.subr.bf16.mxu1 %v3170_v6 }
 0x7de   : > { %2163 = vmatpush3.bf16.msra.mxu1 %v2437_v8 }
 0x7df   : > { %2164 = vmatprep.subr.bf16.mxu1 %v3170_v6 }
 0x7e2   : > { %2165 = vmatpush3.bf16.msra.mxu1 %v2438_v9 }
 0x7e3   : > { %2166 = vmatprep.subr.bf16.mxu1 %v3170_v6 }
 0x7e6   : > { %2167 = vmatpush3.bf16.msra.mxu1 %v2439_v10 }
 0x8ac   : > { %v1464_v45 = vpop.f32.mrb[12].mxu1 }
 0x8ad   : > { %v1465_v46 = vadd.f32 %v2045_v44, %v1464_v45  ;;  %v2150_v47 = vpop.f32.mrb[13].mxu1 }
 0x8ae   : > { %v1467_v48 = vpop.f32.mrb[14].mxu1 }
 0x8af   : > { %v1470_v49 = vadd.f32 %v1465_v46, %v3902_v22  ;;  %v2151_v50 = vpop.f32.mrb[15].mxu1  ;;  %v2061_v46 = vld [vmem:[#allocation32] ss:$0 sm:$0xff]  ;;  %v2062_v48 = vld [vmem:[#allocation33] ss:$0 sm:$0xff] }
 0x8b1   : > { %v1473_v51 = vsel %vm934_vm0, %v1470_v49, 0.0  ;;  %v1477_v52 = vmul.f32 %v1470_v49, %v1470_v49 }
 0x8b2   : > { %1474 = vadd.xlane.f32.xlu1 %v1473_v51 }
 0x8b3   : > { %v1478_v53 = vsel %vm934_vm0, %v1477_v52, 0.0 }
 0x8b4   : > { %1479 = vadd.xlane.f32.xlu0 %v1478_v53 }
 0x93f   : > { %v1475_v56 = vpop.xlane.xlu1 %1474 }
 0x940   : > { %v1476_v57 = vmul.f32 0.03125, %v1475_v56 }
 0x941   : > { %v1480_v58 = vpop.xlane.xlu0 %1479 }
 0x942   : > { %v1482_v59 = vmul.f32 %v1476_v57, %v1476_v57  ;;  %v1481_v60 = vmul.f32 0.03125, %v1480_v58  ;;  %v1484_v62 = vsub.f32 %v1470_v49, %v1476_v57 }
 0x944   : > { %v1483_v22 = vsub.f32 %v1481_v60, %v1482_v59 }
 0x946   : > { %v1485_v61 = vadd.f32 1e-12, %v1483_v22 }
 0x948   : > { %2450 = vrsqrt.f32 %v1485_v61 }
 0x952   : > { %v2451_v63 = vpop.eup %2450 }
 0x953   : > { %v1487_v1 = vmul.f32 %v2451_v63, %v1484_v62 }
 0x955   : > { %v1494_v3 = vmul.f32 %v2049_v0, %v1487_v1 }
 0x957   : > { %v1501_v4 = vadd.f32 %v2050_v2, %v1494_v3 }
 0x959   : > { %v1502_v5 = vpack.c.bf16 %v1501_v4, %v1501_v4 }
 0x95b   : > { %2157 = vmatmul.mubr.msk.bf16.vlgmr.msra.gmra.mrb[16].mxu0 %vm934_vm0, %v1502_v5 }
 0xa2e   : > { %v1563_v12 = vpop.f32.mrb[16].mxu0 }
 0xa2f   : > { %v1564_v13 = vadd.f32 %v2051_v11, %v1563_v12  ;;  %v2158_v14 = vpop.f32.mrb[17].mxu0 }
 0xa30   : > { %v1566_v15 = vpop.f32.mrb[18].mxu0 }
 0xa31   : > { %v1569_v16 = vmul.f32 %v1564_v13, %v1564_v13  ;;  %v2159_v17 = vpop.f32.mrb[19].mxu0 }
 0xa33   : > { %v1570_v18 = vmul.f32 %v1569_v16, %v1564_v13 }
 0xa35   : > { %v1571_v19 = vmul.f32 0.044715, %v1570_v18 }
 0xa37   : > { %v1572_v20 = vadd.f32 %v1571_v19, %v1564_v13 }
 0xa39   : > { %v1573_v21 = vmul.f32 0.7978846, %v1572_v20 }
 0xa3b   : > { %2452 = vtanh.f32 %v1573_v21 }
 0xa45   : > { %v2453_v23 = vpop.eup %2452 }
 0xa46   : > { %v1575_v24 = vadd.f32 1.0, %v2453_v23 }
 0xa48   : > { %v1576_v25 = vmul.f32 0.5, %v1575_v24 }
 0xa4a   : > { %v1577_v26 = vmul.f32 %v1576_v25, %v1564_v13 }
 0xa4c   : > { %v1578_v6 = vpack.c.bf16 %v1577_v26, %v1577_v26 }
 0xa4e   : > { %2169 = vmatmul.mubr.msk.bf16.vlgmr.msra.gmra.mrb[16].mxu1 %vm1618_vm7, %v1578_v6 }
 0xb21   : > { %v1656_v28 = vpop.f32.mrb[16].mxu1 }
 0xb22   : > { %v1657_v29 = vadd.f32 %v2055_v27, %v1656_v28  ;;  %v2170_v30 = vpop.f32.mrb[17].mxu1 }
 0xb23   : > { %v1659_v31 = vpop.f32.mrb[18].mxu1 }
 0xb24   : > { %v1662_v32 = vadd.f32 %v1657_v29, %v1501_v4  ;;  %v2171_v33 = vpop.f32.mrb[19].mxu1 }
 0xb26   : > { %v1665_v34 = vsel %vm934_vm0, %v1662_v32, 0.0  ;;  %v1669_v35 = vmul.f32 %v1662_v32, %v1662_v32 }
 0xb27   : > { %1666 = vadd.xlane.f32.xlu1 %v1665_v34 }
 0xb28   : > { %v1670_v36 = vsel %vm934_vm0, %v1669_v35, 0.0 }
 0xb2b   : > { %1671 = vadd.xlane.f32.xlu1 %v1670_v36 }
 0xbb4   : > { %v1667_v37 = vpop.xlane.xlu1 %1666 }
 0xbb5   : > { %v1668_v38 = vmul.f32 0.03125, %v1667_v37 }
 0xbb7   : > { %v1674_v40 = vmul.f32 %v1668_v38, %v1668_v38  ;;  %v1676_v44 = vsub.f32 %v1662_v32, %v1668_v38 }
 0xbb8   : > { %v1672_v39 = vpop.xlane.xlu1 %1671 }
 0xbb9   : > { %v1673_v41 = vmul.f32 0.03125, %v1672_v39 }
 0xbbb   : > { %v1675_v42 = vsub.f32 %v1673_v41, %v1674_v40 }
 0xbbd   : > { %v1677_v43 = vadd.f32 1e-12, %v1675_v42 }
 0xbbf   : > { %2454 = vrsqrt.f32 %v1677_v43 }
 0xbc9   : > { %v2455_v45 = vpop.eup %2454 }
 0xbca   : > { %v1679_v47 = vmul.f32 %v2455_v45, %v1676_v44 }
 0xbcc   : > { %v1686_v49 = vmul.f32 %v2061_v46, %v1679_v47 }
 0xbce   : > { %v1693_v50 = vadd.f32 %v2062_v48, %v1686_v49 }
 0xbd0   : > { %1694 = vst.msk [vmem:[%s929_s4] sm:$0xff] %vm934_vm0, %v1693_v50 }
 0xbd1   : > { %3033 = shalt.err (!%p3030_p11)
}
 0xbd2   : > { %s3034_s19 = scalar_lea.hbm %s3967_s8, 128  ;;  %s3038_s30 = scalar_lea.hbm %s4138_s29, 256 }
 0xbd3   : > { %p3035_p5 = scmp.ne.s32.totalorder %s3967_s8, %s3034_s19  ;;  %p3039_p8 = scmp.lt.u32.totalorder %s3967_s8, %s4138_s29 }
 0xbd4   : > { %p3040_p9 = scmp.lt.u32.totalorder %s3038_s30, %s3034_s19  ;;  %p3042_p6 = scmp.lt.u32.totalorder %s3034_s19, %s3967_s8 }
 0xbd5   : > { %p3036_p7 = pnand %p3035_p5, %p4139_p3 }
 0xbd6   : > { %p3041_p4 = por %p3040_p9, %p3039_p8 }
 0xbd7   : > { %p3037_p2 = pneg %p3036_p7 }
 0xbd8   : > { %p3043_p12 = por %p3042_p6, %p3041_p4 }
 0xbda   : > { %p3044_p0 = pnand %p3043_p12, %p3037_p2 }
 0xbdc   : > { %3047 = shalt.err (!%p3044_p0)
}
 0xbdd   : > { %2248 = dma.vmem_to_hbm [thread:$0]  (%p4139_p3), %s3969_s22, 128, %s3967_s8, %s1696_s20  }
 0xbde PF: > { %s4140_s4 = sld [smem:[#allocation49_spill]]  ;;  %p4141_p10 = scmp.ne.s32.totalorder %s4106_s2, 0 }
 0xbdf   : > { %p4142_p13 = scmp.ge.s32.totalorder %s3146_s25, 2 }
 0xbe1   : > { %p2313_p1 = pnand %p4142_p13, %p4141_p10 }
 0xbe4   : > { %s1722_s24 = sand.u32 1, %s4140_s4  }
 0xbe5   : > { %s1723_s11 = scalar_lea.sflag [#allocation5], %s1722_s24 }
 0xbe6   : > { %3121 = dma.done.wait (!%p2313_p1), %s1723_s11, 128  }
 0xbe7   : > { %3123 = vsyncadd (!%p2313_p1), %s1723_s11, 4294967168  ;;  %s48_s25 = sadd.s32 1, %s3146_s25   ;;  %s4143_s1 = sld [smem:[#allocation50_spill]] }
 0xbe8   : > { %p45_p11 = scmp.ge.s32.totalorder %s48_s25, 4   ;;  %s4144_s22 = sld [smem:[#allocation51_spill]] }
 0xbe9   : > { %s4145_s24 = sld [smem:[#allocation53_spill]]  ;;  %s4146_s9 = smov %s4150_s23 }
 0xbea   : > { %s4147_s23 = smov %s3751_s3  ;;  %s4148_s2 = smov %s4146_s9 }
 0xbeb   :  { %47 = sbr.rel (!%p45_p11) target bundleno = 32 (0x20), region = 230 }
 0xbf2   :  { %1728 = vsyncpa [#allocation4], 1 }
 0xbf3   :  { %1730 = vsyncpa [#allocation4 + $0x1], 1 }
 0xbf4   :  { %1731 = vsyncpa [#allocation7], 1 }
 0xbf5   :  { %1733 = vsyncpa [#allocation7 + $0x1], 1 }
 0xbf6   :  { %1734 = vsyncpa [#allocation10], 1 }
 0xbf7   :  { %1735 = vsyncpa [#allocation13], 1 }
 0xbf8   :  { %1736 = vsyncpa [#allocation16], 1 }
 0xbf9   :  { %1737 = vsyncpa [#allocation19], 1 }
 0xbfa   :  { %1738 = vsyncpa [#allocation22], 1 }
 0xbfb   :  { %1739 = vsyncpa [#allocation25], 1 }
 0xbfc   :  { %1740 = vsyncpa [#allocation28], 1 }
 0xbfd   :  { %1741 = vsyncpa [#allocation31], 1 }
 0xbfe   :  { %1742 = vsyncpa [#allocation34], 1 }
 0xbff   :  { %1743 = vsyncpa [#allocation5], 1 }
 0xc00   :  { %1745 = vsyncpa [#allocation5 + $0x1], 1 }

</bundles_post_ra>
